<compile_context>
chip_gen: v6e
topology: v6e:2x2x1
jax: 0.10.0
libtpu: 0.0.40
codegen_flags: <defaults>
</compile_context>

<pallas_src>
import jax
import jax.numpy as jnp
from jax.experimental import pallas as pl
from jax.experimental.pallas import tpu as pltpu


# ----------------------------------------------------------------------------
# Fused Pallas kernel: input projection + fused BiLSTM recurrence + fc
#                      accumulation + log_softmax
# ----------------------------------------------------------------------------
def _nernet_kernel(x_ref, wih_ref, bih_ref, whh_ref, fcw_ref, fcb_ref,
                   mask_ref, out_ref, xp_ref):
    T, Bp, Cp = out_ref.shape
    H8 = xp_ref.shape[2]
    H4 = H8 // 2
    H = H4 // 4
    Bp2 = 2 * Bp

    # ---- hoisted input projection for BOTH directions (one bf16 MXU op) ----
    proj = (jnp.dot(x_ref[...], wih_ref[...],
                    preferred_element_type=jnp.float32)
            + bih_ref[...])                                   # (T*Bp, 8H) f32
    xp_ref[...] = proj.reshape(T, Bp, H8)                     # single slab store

    # ---- init logits with fc bias: one lane-dense (T, Bp, 128) store ----
    out_ref[...] = jnp.broadcast_to(fcb_ref[...].reshape(1, 1, Cp), (T, Bp, Cp))

    whh = whh_ref[...]                                        # (H, 8H)  bf16
    fcw = fcw_ref[...]                                        # (H, 2Cp) bf16

    def step(s, carry):
        hc, cc = carry                                        # (2Bp, H) f32
        tb = T - 1 - s

        # one recurrent matmul driving BOTH chains (diagonal blocks used)
        rec = jnp.dot(hc.astype(jnp.bfloat16), whh,
                      preferred_element_type=jnp.float32)     # (2Bp, 8H) f32
        pre_f = xp_ref[s]                                     # (Bp, 8H) f32
        pre_b = xp_ref[tb]
        gates = jnp.concatenate(
            [pre_f[:, :H4] + rec[:Bp, :H4],                   # fwd gates
             pre_b[:, H4:] + rec[Bp:, H4:]], axis=0)          # bwd gates -> (2Bp,4H)

        i = jax.nn.sigmoid(gates[:, 0 * H:1 * H])
        f = jax.nn.sigmoid(gates[:, 1 * H:2 * H])
        g = jnp.tanh(gates[:, 2 * H:3 * H])
        o = jax.nn.sigmoid(gates[:, 3 * H:4 * H])
        cc_new = f * cc + i * g
        hc_new = o * jnp.tanh(cc_new)

        # hoisted length mask (0/1 f32), broadcast exactly once per step
        m = jnp.broadcast_to(mask_ref[s], (Bp2, H))
        hc = hc + m * (hc_new - hc)                           # freeze past len
        cc = cc + m * (cc_new - cc)
        h_out = m * hc_new                                    # padding_value=0

        # fc contribution accumulated now: lane-dense (Bp, 128) stores only
        contrib = jnp.dot(h_out.astype(jnp.bfloat16), fcw,
                          preferred_element_type=jnp.float32)  # (2Bp, 2Cp) f32
        out_ref[s] = out_ref[s] + contrib[:Bp, :Cp]            # fwd -> time s
        out_ref[tb] = out_ref[tb] + contrib[Bp:, Cp:]          # bwd -> time T-1-s
        return hc, cc

    zeros = jnp.zeros((Bp2, H), jnp.float32)
    jax.lax.fori_loop(0, T, step, (zeros, zeros), unroll=min(T, 8))

    # ---- fused log_softmax epilogue over the in-VMEM logits (f32) ----
    logits = out_ref[...].reshape(T * Bp, Cp)
    mx = jnp.max(logits, axis=-1, keepdims=True)
    lse = mx + jnp.log(jnp.sum(jnp.exp(logits - mx), axis=-1, keepdims=True))
    out_ref[...] = (logits - lse).reshape(T, Bp, Cp)


def nernet_pallas(x2d, wih, bih, whh, fcw, fcb, maskcat):
    TBp, E = x2d.shape
    T = maskcat.shape[0]
    Bp = maskcat.shape[1] // 2
    H = whh.shape[0]
    Cp = fcb.shape[1]

    def full(shape):
        return pl.BlockSpec(shape, lambda *_: (0,) * len(shape))

    def nbytes(a):
        return a.size * a.dtype.itemsize

    flops = (2 * T * Bp * E * 8 * H          # input projection
             + T * 2 * (2 * Bp) * H * 8 * H  # recurrent matmuls (2x redundant)
             + T * 2 * (2 * Bp) * H * 2 * Cp)  # per-step fc matmuls
    transcendentals = T * (2 * Bp) * 5 * H + T * Bp * (Cp + 1)
    bytes_accessed = (sum(nbytes(a) for a in
                          (x2d, wih, bih, whh, fcw, fcb, maskcat))
                      + T * Bp * Cp * 4)

    return pl.pallas_call(
        _nernet_kernel,
        out_shape=jax.ShapeDtypeStruct((T, Bp, Cp), jnp.float32),
        grid_spec=pltpu.PrefetchScalarGridSpec(
            num_scalar_prefetch=0,
            grid=(1,),
            in_specs=[full((TBp, E)),            # features, already (T*Bp, E) bf16
                      full((E, 8 * H)),          # [Wih_f | Wih_b]            bf16
                      full((1, 8 * H)),          # [b_f | b_b]                 f32
                      full((H, 8 * H)),          # [Whh_f | Whh_b]            bf16
                      full((H, 2 * Cp)),         # [fcw_f | fcw_b] (lane-padded) bf16
                      full((1, Cp)),             # fc_b (padded with -1e30)     f32
                      full((T, 2 * Bp, 1))],     # stacked fwd/bwd length mask  f32
            out_specs=full((T, Bp, Cp)),
            scratch_shapes=[pltpu.VMEM((T, Bp, 8 * H), jnp.float32)]),  # x-proj slab
        compiler_params=pltpu.CompilerParams(
            dimension_semantics=("arbitrary",),
            vmem_limit_bytes=32 * 1024 * 1024),   # far above working set here
        cost_estimate=pl.CostEstimate(
            flops=int(flops),
            transcendentals=int(transcendentals),
            bytes_accessed=int(bytes_accessed)),
    )(x2d, wih, bih, whh, fcw, fcb, maskcat)


# ----------------------------------------------------------------------------
# Glue (embedding lookups) + full forward
# ----------------------------------------------------------------------------
def _embed_concat(params, x):
    xt, xp, xc, xC, xn = x
    et = jnp.take(params["token_embed"], xt, axis=0)          # (B, T, Dt)
    ep = jnp.take(params["pos_embed"], xp, axis=0)            # (B, T, Dp)
    ec = jnp.take(params["char_embed"], xc, axis=0).mean(2)   # (B, T, Dc)
    eC = jnp.take(params["isCap_embed"], xC, axis=0)
    en = jnp.take(params["isNum_embed"], xn, axis=0)
    # dropouts are identity (eval-mode forward)
    return jnp.concatenate([et, ep, ec, eC, en], axis=2)      # (B, T, E)


def nernet_pos_forward(params, x, x_len, H):
    xt = x[0]
    B, T = xt.shape
    C = params["fc_b"].shape[1]
    Cp = ((C + 127) // 128) * 128                             # lane-dense output
    Bp = max(8, ((B + 7) // 8) * 8)                           # 8-sublane batch pad

    feat = _embed_concat(params, x)                           # (B, T, E)
    E = feat.shape[2]
    x_tbe = jnp.transpose(feat, (1, 0, 2)).astype(jnp.float32)
    x_tbe = jnp.pad(x_tbe, ((0, 0), (0, Bp - B), (0, 0)))
    x2d = x_tbe.reshape(T * Bp, E).astype(jnp.bfloat16)       # MXU operand

    # precomputed 0/1 length mask, fwd stacked with time-reversed bwd
    lens = jnp.pad(x_len.astype(jnp.int32), (0, Bp - B))      # (Bp,)
    tids = jnp.arange(T, dtype=jnp.int32)[:, None]            # (T, 1)
    mask_f = (tids < lens[None, :]).astype(jnp.float32)       # (T, Bp)
    maskcat = jnp.concatenate([mask_f, mask_f[::-1]], axis=1).reshape(T, 2 * Bp, 1)

    # weight packing (bf16 MXU operands; biases stay f32)
    wih = jnp.concatenate([params["wih_f"], params["wih_b"]],
                          axis=1).astype(jnp.bfloat16)        # (E, 8H)
    bih = jnp.concatenate([params["b_f"], params["b_b"]], axis=1)   # (1, 8H) f32
    whh = jnp.concatenate([params["whh_f"], params["whh_b"]],
                          axis=1).astype(jnp.bfloat16)        # (H, 8H)
    fcw = params["fc_w"]                                      # (2H, C)
    fcw_f = jnp.pad(fcw[:H], ((0, 0), (0, Cp - C)))
    fcw_b = jnp.pad(fcw[H:], ((0, 0), (0, Cp - C)))
    fcw_cat = jnp.concatenate([fcw_f, fcw_b], axis=1).astype(jnp.bfloat16)  # (H, 2Cp)
    fcb = jnp.pad(params["fc_b"], ((0, 0), (0, Cp - C)),
                  constant_values=-1e30)                      # (1, Cp) f32

    out = nernet_pallas(x2d, wih, bih, whh, fcw_cat, fcb, maskcat)  # (T, Bp, Cp)
    return jnp.transpose(out, (1, 0, 2))[:B, :, :C]           # (B, T, C)


# ----------------------------------------------------------------------------
# Pure-JAX f32 reference (numerical self-check)
# ----------------------------------------------------------------------------
def _ref_lstm_dir(x_tbe, lens, wih, whh, b, H, reverse):
    T, B, _ = x_tbe.shape
    h = jnp.zeros((B, H), jnp.float32)
    c = jnp.zeros((B, H), jnp.float32)
    outs = [None] * T
    order = range(T - 1, -1, -1) if reverse else range(T)
    for t in order:
        gates = x_tbe[t] @ wih + h @ whh + b
        i = jax.nn.sigmoid(gates[:, :H])
        f = jax.nn.sigmoid(gates[:, H:2 * H])
        g = jnp.tanh(gates[:, 2 * H:3 * H])
        o = jax.nn.sigmoid(gates[:, 3 * H:])
        c_new = f * c + i * g
        h_new = o * jnp.tanh(c_new)
        mask = lens > t
        h = jnp.where(mask, h_new, h)
        c = jnp.where(mask, c_new, c)
        outs[t] = jnp.where(mask, h_new, 0.0)
    return jnp.stack(outs, axis=0)


def reference_forward(params, x, x_len, H):
    xt = x[0]
    B, T = xt.shape
    feat = _embed_concat(params, x)
    x_tbe = jnp.transpose(feat, (1, 0, 2)).astype(jnp.float32)
    lens = x_len.reshape(B, 1).astype(jnp.int32)
    of = _ref_lstm_dir(x_tbe, lens, params["wih_f"], params["whh_f"],
                       params["b_f"], H, reverse=False)
    ob = _ref_lstm_dir(x_tbe, lens, params["wih_b"], params["whh_b"],
                       params["b_b"], H, reverse=True)
    out = jnp.concatenate([of, ob], axis=-1)
    out = jnp.transpose(out, (1, 0, 2)).reshape(B * T, 2 * H)
    logits = out @ params["fc_w"] + params["fc_b"]
    return jax.nn.log_softmax(logits, axis=1).reshape(B, T, -1)


# ----------------------------------------------------------------------------
# Deterministic parameter init (shapes from NERNetPOS.__init__)
# ----------------------------------------------------------------------------
def init_params(key, vocabs, dims, H, num_class):
    E = sum(dims.values())
    ks = iter(jax.random.split(key, 16))
    p = {}
    for name in ("token", "pos", "char", "isCap", "isNum"):
        p[f"{name}_embed"] = 0.1 * jax.random.normal(
            next(ks), (vocabs[name], dims[name]), jnp.float32)

    kscale = 1.0 / (H ** 0.5)
    for d in ("f", "b"):
        wih = jax.random.uniform(next(ks), (4 * H, E), jnp.float32, -kscale, kscale)
        whh = jax.random.uniform(next(ks), (4 * H, H), jnp.float32, -kscale, kscale)
        bih = jax.random.uniform(next(ks), (4 * H,), jnp.float32, -kscale, kscale)
        bhh = jax.random.uniform(next(ks), (4 * H,), jnp.float32, -kscale, kscale)
        # forget-gate bias set to 1.0 in BOTH bias_ih and bias_hh (as in __init__)
        bih = bih.at[H:2 * H].set(1.0)
        bhh = bhh.at[H:2 * H].set(1.0)
        p[f"wih_{d}"] = wih.T                                  # (E, 4H)
        p[f"whh_{d}"] = whh.T                                  # (H, 4H)
        p[f"b_{d}"] = (bih + bhh).reshape(1, 4 * H)            # (1, 4H)

    fscale = 1.0 / ((2 * H) ** 0.5)
    p["fc_w"] = jax.random.uniform(next(ks), (num_class, 2 * H),
                                   jnp.float32, -fscale, fscale).T   # (2H, C)
    p["fc_b"] = jax.random.uniform(next(ks), (1, num_class),
                                   jnp.float32, -fscale, fscale)
    return p


if __name__ == "__main__":
    B, T, Lc = 2, 8, 5
    H, num_class = 32, 9
    vocabs = {"token": 50, "pos": 17, "char": 30, "isCap": 2, "isNum": 2}
    dims = {"token": 16, "pos": 8, "char": 8, "isCap": 4, "isNum": 4}   # E = 40

    key = jax.random.PRNGKey(0)
    kp, k1, k2, k3, k4, k5 = jax.random.split(key, 6)
    params = init_params(kp, vocabs, dims, H, num_class)

    xt = jax.random.randint(k1, (B, T), 0, vocabs["token"], jnp.int32)
    xp = jax.random.randint(k2, (B, T), 0, vocabs["pos"], jnp.int32)
    xc = jax.random.randint(k3, (B, T, Lc), 0, vocabs["char"], jnp.int32)
    xC = jax.random.randint(k4, (B, T), 0, vocabs["isCap"], jnp.int32)
    xn = jax.random.randint(k5, (B, T), 0, vocabs["isNum"], jnp.int32)
    x_len = jnp.array([T, 5], dtype=jnp.int32)   # max length == T (as view() requires)

    out = nernet_pos_forward(params, (xt, xp, xc, xC, xn), x_len, H)
    out = jax.block_until_ready(out)

    ref = jax.block_until_ready(
        reference_forward(params, (xt, xp, xc, xC, xn), x_len, H))

    assert out.shape == (B, T, num_class), out.shape
    assert bool(jnp.all(jnp.isfinite(out)))
    # bf16 MXU operands vs pure-f32 reference -> slightly looser tolerance
    assert bool(jnp.allclose(out, ref, atol=2e-2, rtol=2e-2)), (
        float(jnp.max(jnp.abs(out - ref))))

    print("KERNEL_OK")
</pallas_src>

<mosaic_0001>
module attributes {stable_mosaic.version = 11 : i64} {
  func.func @_nernet_kernel(%arg0: i32, %arg1: memref<64x40xbf16, #tpu.memory_space<vmem>>, %arg2: memref<40x256xbf16, #tpu.memory_space<vmem>>, %arg3: memref<1x256xf32, #tpu.memory_space<vmem>>, %arg4: memref<32x256xbf16, #tpu.memory_space<vmem>>, %arg5: memref<32x256xbf16, #tpu.memory_space<vmem>>, %arg6: memref<1x128xf32, #tpu.memory_space<vmem>>, %arg7: memref<8x16x1xf32, #tpu.memory_space<vmem>>, %arg8: memref<8x8x128xf32, #tpu.memory_space<vmem>>, %arg9: memref<8x8x256xf32, #tpu.memory_space<vmem>>) attributes {dimension_semantics = [#tpu.dimension_semantics<arbitrary>], iteration_bounds = array<i64: 1>, scalar_prefetch = 0 : i64, scratch_operands = 1 : i64, tpu.core_type = #tpu.core_type<tc>, window_params = [{pipeline_mode = #tpu.pipeline_mode<synchronous>, transform_indices = @transform_0, window_bounds = array<i64: 64, 40>}, {pipeline_mode = #tpu.pipeline_mode<synchronous>, transform_indices = @transform_1, window_bounds = array<i64: 40, 256>}, {pipeline_mode = #tpu.pipeline_mode<synchronous>, transform_indices = @transform_2, window_bounds = array<i64: 1, 256>}, {pipeline_mode = #tpu.pipeline_mode<synchronous>, transform_indices = @transform_3, window_bounds = array<i64: 32, 256>}, {pipeline_mode = #tpu.pipeline_mode<synchronous>, transform_indices = @transform_4, window_bounds = array<i64: 32, 256>}, {pipeline_mode = #tpu.pipeline_mode<synchronous>, transform_indices = @transform_5, window_bounds = array<i64: 1, 128>}, {pipeline_mode = #tpu.pipeline_mode<synchronous>, transform_indices = @transform_6, window_bounds = array<i64: 8, 16, 1>}, {pipeline_mode = #tpu.pipeline_mode<synchronous>, transform_indices = @transform_7, window_bounds = array<i64: 8, 8, 128>}]} {
    %c0 = arith.constant 0 : index
    %c0_0 = arith.constant 0 : index
    %0 = vector.load %arg1[%c0, %c0_0] : memref<64x40xbf16, #tpu.memory_space<vmem>>, vector<64x40xbf16>
    %c0_1 = arith.constant 0 : index
    %c0_2 = arith.constant 0 : index
    %1 = vector.load %arg2[%c0_1, %c0_2] : memref<40x256xbf16, #tpu.memory_space<vmem>>, vector<40x256xbf16>
    %cst = arith.constant dense<0.000000e+00> : vector<64x256xf32>
    %2 = tpu.matmul %0, %1, %cst {dimension_numbers = #tpu.dot_dimension_numbers<[1], [0], [0], [1], [0, 0, 1, 1], [], []>} : vector<64x40xbf16>, vector<40x256xbf16>, vector<64x256xf32> -> vector<64x256xf32>
    %c0_3 = arith.constant 0 : index
    %c0_4 = arith.constant 0 : index
    %3 = vector.load %arg3[%c0_3, %c0_4] : memref<1x256xf32, #tpu.memory_space<vmem>>, vector<1x256xf32>
    %4 = vector.broadcast %3 : vector<1x256xf32> to vector<64x256xf32>
    %5 = arith.addf %2, %4 : vector<64x256xf32>
    %6 = vector.shape_cast %5 : vector<64x256xf32> to vector<8x8x256xf32>
    %c0_5 = arith.constant 0 : index
    %c0_6 = arith.constant 0 : index
    %c0_7 = arith.constant 0 : index
    %7 = vector.load %arg9[%c0_5, %c0_6, %c0_7] : memref<8x8x256xf32, #tpu.memory_space<vmem>>, vector<8x8x256xf32>
    tpu.vector_store %arg9[%c0_5, %c0_6, %c0_7], %6 {strides = array<i32>} : memref<8x8x256xf32, #tpu.memory_space<vmem>>, vector<8x8x256xf32>,
    %c0_8 = arith.constant 0 : index
    %c0_9 = arith.constant 0 : index
    %8 = vector.load %arg6[%c0_8, %c0_9] : memref<1x128xf32, #tpu.memory_space<vmem>>, vector<1x128xf32>
    %9 = vector.shape_cast %8 : vector<1x128xf32> to vector<1x1x128xf32>
    %10 = vector.shape_cast %9 : vector<1x1x128xf32> to vector<1x1x128xf32>
    %11 = vector.broadcast %10 : vector<1x1x128xf32> to vector<8x8x128xf32>
    %c0_10 = arith.constant 0 : index
    %c0_11 = arith.constant 0 : index
    %c0_12 = arith.constant 0 : index
    %12 = vector.load %arg8[%c0_10, %c0_11, %c0_12] : memref<8x8x128xf32, #tpu.memory_space<vmem>>, vector<8x8x128xf32>
    tpu.vector_store %arg8[%c0_10, %c0_11, %c0_12], %11 {strides = array<i32>} : memref<8x8x128xf32, #tpu.memory_space<vmem>>, vector<8x8x128xf32>,
    %c0_13 = arith.constant 0 : index
    %c0_14 = arith.constant 0 : index
    %13 = vector.load %arg4[%c0_13, %c0_14] : memref<32x256xbf16, #tpu.memory_space<vmem>>, vector<32x256xbf16>
    %c0_15 = arith.constant 0 : index
    %c0_16 = arith.constant 0 : index
    %14 = vector.load %arg5[%c0_15, %c0_16] : memref<32x256xbf16, #tpu.memory_space<vmem>>, vector<32x256xbf16>
    %cst_17 = arith.constant 0.000000e+00 : f32
    %15 = vector.broadcast %cst_17 : f32 to vector<16x32xf32>
    %c0_i32 = arith.constant 0 : i32
    %c7_i32 = arith.constant 7 : i32
    %16 = arith.subi %c7_i32, %c0_i32 : i32
    %17 = arith.truncf %15 : vector<16x32xf32> to vector<16x32xbf16>
    %cst_18 = arith.constant dense<0.000000e+00> : vector<16x256xf32>
    %18 = tpu.matmul %17, %13, %cst_18 {dimension_numbers = #tpu.dot_dimension_numbers<[1], [0], [0], [1], [0, 0, 1, 1], [], []>} : vector<16x32xbf16>, vector<32x256xbf16>, vector<16x256xf32> -> vector<16x256xf32>
    %19 = arith.index_cast %c0_i32 : i32 to index
    %c0_19 = arith.constant 0 : index
    %c0_20 = arith.constant 0 : index
    %20 = vector.load %arg9[%19, %c0_19, %c0_20] : memref<8x8x256xf32, #tpu.memory_space<vmem>>, vector<1x8x256xf32>
    %21 = vector.shape_cast %20 : vector<1x8x256xf32> to vector<8x256xf32>
    %22 = arith.index_cast %16 : i32 to index
    %c0_21 = arith.constant 0 : index
    %c0_22 = arith.constant 0 : index
    %23 = vector.load %arg9[%22, %c0_21, %c0_22] : memref<8x8x256xf32, #tpu.memory_space<vmem>>, vector<1x8x256xf32>
    %24 = vector.shape_cast %23 : vector<1x8x256xf32> to vector<8x256xf32>
    %25 = vector.extract_strided_slice %21 {offsets = [0, 0], sizes = [8, 128], strides = [1, 1]} : vector<8x256xf32> to vector<8x128xf32>
    %26 = vector.extract_strided_slice %18 {offsets = [0, 0], sizes = [8, 128], strides = [1, 1]} : vector<16x256xf32> to vector<8x128xf32>
    %27 = arith.addf %25, %26 : vector<8x128xf32>
    %28 = vector.extract_strided_slice %24 {offsets = [0, 128], sizes = [8, 128], strides = [1, 1]} : vector<8x256xf32> to vector<8x128xf32>
    %29 = vector.extract_strided_slice %18 {offsets = [8, 128], sizes = [8, 128], strides = [1, 1]} : vector<16x256xf32> to vector<8x128xf32>
    %30 = arith.addf %28, %29 : vector<8x128xf32>
    %31 = tpu.concatenate %27, %30 in 0 : vector<8x128xf32>, vector<8x128xf32> -> vector<16x128xf32>
    %32 = vector.extract_strided_slice %31 {offsets = [0, 0], sizes = [16, 32], strides = [1, 1]} : vector<16x128xf32> to vector<16x32xf32>
    %33 = arith.negf %32 : vector<16x32xf32>
    %34 = math.exp %33 : vector<16x32xf32>
    %cst_23 = arith.constant 1.000000e+00 : f32
    %35 = vector.broadcast %cst_23 : f32 to vector<16x32xf32>
    %36 = arith.addf %35, %34 : vector<16x32xf32>
    %37 = arith.divf %35, %36 : vector<16x32xf32>
    %38 = vector.extract_strided_slice %31 {offsets = [0, 32], sizes = [16, 32], strides = [1, 1]} : vector<16x128xf32> to vector<16x32xf32>
    %39 = arith.negf %38 : vector<16x32xf32>
    %40 = math.exp %39 : vector<16x32xf32>
    %cst_24 = arith.constant 1.000000e+00 : f32
    %41 = vector.broadcast %cst_24 : f32 to vector<16x32xf32>
    %42 = arith.addf %41, %40 : vector<16x32xf32>
    %43 = arith.divf %41, %42 : vector<16x32xf32>
    %44 = vector.extract_strided_slice %31 {offsets = [0, 64], sizes = [16, 32], strides = [1, 1]} : vector<16x128xf32> to vector<16x32xf32>
    %45 = math.tanh %44 : vector<16x32xf32>
    %46 = vector.extract_strided_slice %31 {offsets = [0, 96], sizes = [16, 32], strides = [1, 1]} : vector<16x128xf32> to vector<16x32xf32>
    %47 = arith.negf %46 : vector<16x32xf32>
    %48 = math.exp %47 : vector<16x32xf32>
    %cst_25 = arith.constant 1.000000e+00 : f32
    %49 = vector.broadcast %cst_25 : f32 to vector<16x32xf32>
    %50 = arith.addf %49, %48 : vector<16x32xf32>
    %51 = arith.divf %49, %50 : vector<16x32xf32>
    %52 = arith.mulf %43, %15 : vector<16x32xf32>
    %53 = arith.mulf %37, %45 : vector<16x32xf32>
    %54 = arith.addf %52, %53 : vector<16x32xf32>
    %55 = math.tanh %54 : vector<16x32xf32>
    %56 = arith.mulf %51, %55 : vector<16x32xf32>
    %57 = arith.index_cast %c0_i32 : i32 to index
    %c0_26 = arith.constant 0 : index
    %c0_27 = arith.constant 0 : index
    %58 = vector.load %arg7[%57, %c0_26, %c0_27] : memref<8x16x1xf32, #tpu.memory_space<vmem>>, vector<1x16x1xf32>
    %59 = vector.shape_cast %58 : vector<1x16x1xf32> to vector<16x1xf32>
    %60 = vector.shape_cast %59 : vector<16x1xf32> to vector<16x1xf32>
    %61 = vector.broadcast %60 : vector<16x1xf32> to vector<16x32xf32>
    %62 = arith.subf %56, %15 : vector<16x32xf32>
    %63 = arith.mulf %61, %62 : vector<16x32xf32>
    %64 = arith.addf %15, %63 : vector<16x32xf32>
    %65 = arith.subf %54, %15 : vector<16x32xf32>
    %66 = arith.mulf %61, %65 : vector<16x32xf32>
    %67 = arith.addf %15, %66 : vector<16x32xf32>
    %68 = arith.mulf %61, %56 : vector<16x32xf32>
    %69 = arith.truncf %68 : vector<16x32xf32> to vector<16x32xbf16>
    %cst_28 = arith.constant dense<0.000000e+00> : vector<16x256xf32>
    %70 = tpu.matmul %69, %14, %cst_28 {dimension_numbers = #tpu.dot_dimension_numbers<[1], [0], [0], [1], [0, 0, 1, 1], [], []>} : vector<16x32xbf16>, vector<32x256xbf16>, vector<16x256xf32> -> vector<16x256xf32>
    %71 = arith.index_cast %c0_i32 : i32 to index
    %c0_29 = arith.constant 0 : index
    %c0_30 = arith.constant 0 : index
    %72 = vector.load %arg8[%71, %c0_29, %c0_30] : memref<8x8x128xf32, #tpu.memory_space<vmem>>, vector<1x8x128xf32>
    %73 = vector.shape_cast %72 : vector<1x8x128xf32> to vector<8x128xf32>
    %74 = vector.extract_strided_slice %70 {offsets = [0, 0], sizes = [8, 128], strides = [1, 1]} : vector<16x256xf32> to vector<8x128xf32>
    %75 = arith.addf %73, %74 : vector<8x128xf32>
    %76 = arith.index_cast %c0_i32 : i32 to index
    %c0_31 = arith.constant 0 : index
    %c0_32 = arith.constant 0 : index
    %77 = vector.load %arg8[%76, %c0_31, %c0_32] : memref<8x8x128xf32, #tpu.memory_space<vmem>>, vector<1x8x128xf32>
    %78 = vector.shape_cast %77 : vector<1x8x128xf32> to vector<8x128xf32>
    %79 = vector.shape_cast %75 : vector<8x128xf32> to vector<1x8x128xf32>
    tpu.vector_store %arg8[%76, %c0_31, %c0_32], %79 {strides = array<i32>} : memref<8x8x128xf32, #tpu.memory_space<vmem>>, vector<1x8x128xf32>,
    %80 = arith.index_cast %16 : i32 to index
    %c0_33 = arith.constant 0 : index
    %c0_34 = arith.constant 0 : index
    %81 = vector.load %arg8[%80, %c0_33, %c0_34] : memref<8x8x128xf32, #tpu.memory_space<vmem>>, vector<1x8x128xf32>
    %82 = vector.shape_cast %81 : vector<1x8x128xf32> to vector<8x128xf32>
    %83 = vector.extract_strided_slice %70 {offsets = [8, 128], sizes = [8, 128], strides = [1, 1]} : vector<16x256xf32> to vector<8x128xf32>
    %84 = arith.addf %82, %83 : vector<8x128xf32>
    %85 = arith.index_cast %16 : i32 to index
    %c0_35 = arith.constant 0 : index
    %c0_36 = arith.constant 0 : index
    %86 = vector.load %arg8[%85, %c0_35, %c0_36] : memref<8x8x128xf32, #tpu.memory_space<vmem>>, vector<1x8x128xf32>
    %87 = vector.shape_cast %86 : vector<1x8x128xf32> to vector<8x128xf32>
    %88 = vector.shape_cast %84 : vector<8x128xf32> to vector<1x8x128xf32>
    tpu.vector_store %arg8[%85, %c0_35, %c0_36], %88 {strides = array<i32>} : memref<8x8x128xf32, #tpu.memory_space<vmem>>, vector<1x8x128xf32>,
    %c1_i32 = arith.constant 1 : i32
    %c7_i32_37 = arith.constant 7 : i32
    %89 = arith.subi %c7_i32_37, %c1_i32 : i32
    %90 = arith.truncf %64 : vector<16x32xf32> to vector<16x32xbf16>
    %cst_38 = arith.constant dense<0.000000e+00> : vector<16x256xf32>
    %91 = tpu.matmul %90, %13, %cst_38 {dimension_numbers = #tpu.dot_dimension_numbers<[1], [0], [0], [1], [0, 0, 1, 1], [], []>} : vector<16x32xbf16>, vector<32x256xbf16>, vector<16x256xf32> -> vector<16x256xf32>
    %92 = arith.index_cast %c1_i32 : i32 to index
    %c0_39 = arith.constant 0 : index
    %c0_40 = arith.constant 0 : index
    %93 = vector.load %arg9[%92, %c0_39, %c0_40] : memref<8x8x256xf32, #tpu.memory_space<vmem>>, vector<1x8x256xf32>
    %94 = vector.shape_cast %93 : vector<1x8x256xf32> to vector<8x256xf32>
    %95 = arith.index_cast %89 : i32 to index
    %c0_41 = arith.constant 0 : index
    %c0_42 = arith.constant 0 : index
    %96 = vector.load %arg9[%95, %c0_41, %c0_42] : memref<8x8x256xf32, #tpu.memory_space<vmem>>, vector<1x8x256xf32>
    %97 = vector.shape_cast %96 : vector<1x8x256xf32> to vector<8x256xf32>
    %98 = vector.extract_strided_slice %94 {offsets = [0, 0], sizes = [8, 128], strides = [1, 1]} : vector<8x256xf32> to vector<8x128xf32>
    %99 = vector.extract_strided_slice %91 {offsets = [0, 0], sizes = [8, 128], strides = [1, 1]} : vector<16x256xf32> to vector<8x128xf32>
    %100 = arith.addf %98, %99 : vector<8x128xf32>
    %101 = vector.extract_strided_slice %97 {offsets = [0, 128], sizes = [8, 128], strides = [1, 1]} : vector<8x256xf32> to vector<8x128xf32>
    %102 = vector.extract_strided_slice %91 {offsets = [8, 128], sizes = [8, 128], strides = [1, 1]} : vector<16x256xf32> to vector<8x128xf32>
    %103 = arith.addf %101, %102 : vector<8x128xf32>
    %104 = tpu.concatenate %100, %103 in 0 : vector<8x128xf32>, vector<8x128xf32> -> vector<16x128xf32>
    %105 = vector.extract_strided_slice %104 {offsets = [0, 0], sizes = [16, 32], strides = [1, 1]} : vector<16x128xf32> to vector<16x32xf32>
    %106 = arith.negf %105 : vector<16x32xf32>
    %107 = math.exp %106 : vector<16x32xf32>
    %cst_43 = arith.constant 1.000000e+00 : f32
    %108 = vector.broadcast %cst_43 : f32 to vector<16x32xf32>
    %109 = arith.addf %108, %107 : vector<16x32xf32>
    %110 = arith.divf %108, %109 : vector<16x32xf32>
    %111 = vector.extract_strided_slice %104 {offsets = [0, 32], sizes = [16, 32], strides = [1, 1]} : vector<16x128xf32> to vector<16x32xf32>
    %112 = arith.negf %111 : vector<16x32xf32>
    %113 = math.exp %112 : vector<16x32xf32>
    %cst_44 = arith.constant 1.000000e+00 : f32
    %114 = vector.broadcast %cst_44 : f32 to vector<16x32xf32>
    %115 = arith.addf %114, %113 : vector<16x32xf32>
    %116 = arith.divf %114, %115 : vector<16x32xf32>
    %117 = vector.extract_strided_slice %104 {offsets = [0, 64], sizes = [16, 32], strides = [1, 1]} : vector<16x128xf32> to vector<16x32xf32>
    %118 = math.tanh %117 : vector<16x32xf32>
    %119 = vector.extract_strided_slice %104 {offsets = [0, 96], sizes = [16, 32], strides = [1, 1]} : vector<16x128xf32> to vector<16x32xf32>
    %120 = arith.negf %119 : vector<16x32xf32>
    %121 = math.exp %120 : vector<16x32xf32>
    %cst_45 = arith.constant 1.000000e+00 : f32
    %122 = vector.broadcast %cst_45 : f32 to vector<16x32xf32>
    %123 = arith.addf %122, %121 : vector<16x32xf32>
    %124 = arith.divf %122, %123 : vector<16x32xf32>
    %125 = arith.mulf %116, %67 : vector<16x32xf32>
    %126 = arith.mulf %110, %118 : vector<16x32xf32>
    %127 = arith.addf %125, %126 : vector<16x32xf32>
    %128 = math.tanh %127 : vector<16x32xf32>
    %129 = arith.mulf %124, %128 : vector<16x32xf32>
    %130 = arith.index_cast %c1_i32 : i32 to index
    %c0_46 = arith.constant 0 : index
    %c0_47 = arith.constant 0 : index
    %131 = vector.load %arg7[%130, %c0_46, %c0_47] : memref<8x16x1xf32, #tpu.memory_space<vmem>>, vector<1x16x1xf32>
    %132 = vector.shape_cast %131 : vector<1x16x1xf32> to vector<16x1xf32>
    %133 = vector.shape_cast %132 : vector<16x1xf32> to vector<16x1xf32>
    %134 = vector.broadcast %133 : vector<16x1xf32> to vector<16x32xf32>
    %135 = arith.subf %129, %64 : vector<16x32xf32>
    %136 = arith.mulf %134, %135 : vector<16x32xf32>
    %137 = arith.addf %64, %136 : vector<16x32xf32>
    %138 = arith.subf %127, %67 : vector<16x32xf32>
    %139 = arith.mulf %134, %138 : vector<16x32xf32>
    %140 = arith.addf %67, %139 : vector<16x32xf32>
    %141 = arith.mulf %134, %129 : vector<16x32xf32>
    %142 = arith.truncf %141 : vector<16x32xf32> to vector<16x32xbf16>
    %cst_48 = arith.constant dense<0.000000e+00> : vector<16x256xf32>
    %143 = tpu.matmul %142, %14, %cst_48 {dimension_numbers = #tpu.dot_dimension_numbers<[1], [0], [0], [1], [0, 0, 1, 1], [], []>} : vector<16x32xbf16>, vector<32x256xbf16>, vector<16x256xf32> -> vector<16x256xf32>
    %144 = arith.index_cast %c1_i32 : i32 to index
    %c0_49 = arith.constant 0 : index
    %c0_50 = arith.constant 0 : index
    %145 = vector.load %arg8[%144, %c0_49, %c0_50] : memref<8x8x128xf32, #tpu.memory_space<vmem>>, vector<1x8x128xf32>
    %146 = vector.shape_cast %145 : vector<1x8x128xf32> to vector<8x128xf32>
    %147 = vector.extract_strided_slice %143 {offsets = [0, 0], sizes = [8, 128], strides = [1, 1]} : vector<16x256xf32> to vector<8x128xf32>
    %148 = arith.addf %146, %147 : vector<8x128xf32>
    %149 = arith.index_cast %c1_i32 : i32 to index
    %c0_51 = arith.constant 0 : index
    %c0_52 = arith.constant 0 : index
    %150 = vector.load %arg8[%149, %c0_51, %c0_52] : memref<8x8x128xf32, #tpu.memory_space<vmem>>, vector<1x8x128xf32>
    %151 = vector.shape_cast %150 : vector<1x8x128xf32> to vector<8x128xf32>
    %152 = vector.shape_cast %148 : vector<8x128xf32> to vector<1x8x128xf32>
    tpu.vector_store %arg8[%149, %c0_51, %c0_52], %152 {strides = array<i32>} : memref<8x8x128xf32, #tpu.memory_space<vmem>>, vector<1x8x128xf32>,
    %153 = arith.index_cast %89 : i32 to index
    %c0_53 = arith.constant 0 : index
    %c0_54 = arith.constant 0 : index
    %154 = vector.load %arg8[%153, %c0_53, %c0_54] : memref<8x8x128xf32, #tpu.memory_space<vmem>>, vector<1x8x128xf32>
    %155 = vector.shape_cast %154 : vector<1x8x128xf32> to vector<8x128xf32>
    %156 = vector.extract_strided_slice %143 {offsets = [8, 128], sizes = [8, 128], strides = [1, 1]} : vector<16x256xf32> to vector<8x128xf32>
    %157 = arith.addf %155, %156 : vector<8x128xf32>
    %158 = arith.index_cast %89 : i32 to index
    %c0_55 = arith.constant 0 : index
    %c0_56 = arith.constant 0 : index
    %159 = vector.load %arg8[%158, %c0_55, %c0_56] : memref<8x8x128xf32, #tpu.memory_space<vmem>>, vector<1x8x128xf32>
    %160 = vector.shape_cast %159 : vector<1x8x128xf32> to vector<8x128xf32>
    %161 = vector.shape_cast %157 : vector<8x128xf32> to vector<1x8x128xf32>
    tpu.vector_store %arg8[%158, %c0_55, %c0_56], %161 {strides = array<i32>} : memref<8x8x128xf32, #tpu.memory_space<vmem>>, vector<1x8x128xf32>,
    %c2_i32 = arith.constant 2 : i32
    %c7_i32_57 = arith.constant 7 : i32
    %162 = arith.subi %c7_i32_57, %c2_i32 : i32
    %163 = arith.truncf %137 : vector<16x32xf32> to vector<16x32xbf16>
    %cst_58 = arith.constant dense<0.000000e+00> : vector<16x256xf32>
    %164 = tpu.matmul %163, %13, %cst_58 {dimension_numbers = #tpu.dot_dimension_numbers<[1], [0], [0], [1], [0, 0, 1, 1], [], []>} : vector<16x32xbf16>, vector<32x256xbf16>, vector<16x256xf32> -> vector<16x256xf32>
    %165 = arith.index_cast %c2_i32 : i32 to index
    %c0_59 = arith.constant 0 : index
    %c0_60 = arith.constant 0 : index
    %166 = vector.load %arg9[%165, %c0_59, %c0_60] : memref<8x8x256xf32, #tpu.memory_space<vmem>>, vector<1x8x256xf32>
    %167 = vector.shape_cast %166 : vector<1x8x256xf32> to vector<8x256xf32>
    %168 = arith.index_cast %162 : i32 to index
    %c0_61 = arith.constant 0 : index
    %c0_62 = arith.constant 0 : index
    %169 = vector.load %arg9[%168, %c0_61, %c0_62] : memref<8x8x256xf32, #tpu.memory_space<vmem>>, vector<1x8x256xf32>
    %170 = vector.shape_cast %169 : vector<1x8x256xf32> to vector<8x256xf32>
    %171 = vector.extract_strided_slice %167 {offsets = [0, 0], sizes = [8, 128], strides = [1, 1]} : vector<8x256xf32> to vector<8x128xf32>
    %172 = vector.extract_strided_slice %164 {offsets = [0, 0], sizes = [8, 128], strides = [1, 1]} : vector<16x256xf32> to vector<8x128xf32>
    %173 = arith.addf %171, %172 : vector<8x128xf32>
    %174 = vector.extract_strided_slice %170 {offsets = [0, 128], sizes = [8, 128], strides = [1, 1]} : vector<8x256xf32> to vector<8x128xf32>
    %175 = vector.extract_strided_slice %164 {offsets = [8, 128], sizes = [8, 128], strides = [1, 1]} : vector<16x256xf32> to vector<8x128xf32>
    %176 = arith.addf %174, %175 : vector<8x128xf32>
    %177 = tpu.concatenate %173, %176 in 0 : vector<8x128xf32>, vector<8x128xf32> -> vector<16x128xf32>
    %178 = vector.extract_strided_slice %177 {offsets = [0, 0], sizes = [16, 32], strides = [1, 1]} : vector<16x128xf32> to vector<16x32xf32>
    %179 = arith.negf %178 : vector<16x32xf32>
    %180 = math.exp %179 : vector<16x32xf32>
    %cst_63 = arith.constant 1.000000e+00 : f32
    %181 = vector.broadcast %cst_63 : f32 to vector<16x32xf32>
    %182 = arith.addf %181, %180 : vector<16x32xf32>
    %183 = arith.divf %181, %182 : vector<16x32xf32>
    %184 = vector.extract_strided_slice %177 {offsets = [0, 32], sizes = [16, 32], strides = [1, 1]} : vector<16x128xf32> to vector<16x32xf32>
    %185 = arith.negf %184 : vector<16x32xf32>
    %186 = math.exp %185 : vector<16x32xf32>
    %cst_64 = arith.constant 1.000000e+00 : f32
    %187 = vector.broadcast %cst_64 : f32 to vector<16x32xf32>
    %188 = arith.addf %187, %186 : vector<16x32xf32>
    %189 = arith.divf %187, %188 : vector<16x32xf32>
    %190 = vector.extract_strided_slice %177 {offsets = [0, 64], sizes = [16, 32], strides = [1, 1]} : vector<16x128xf32> to vector<16x32xf32>
    %191 = math.tanh %190 : vector<16x32xf32>
    %192 = vector.extract_strided_slice %177 {offsets = [0, 96], sizes = [16, 32], strides = [1, 1]} : vector<16x128xf32> to vector<16x32xf32>
    %193 = arith.negf %192 : vector<16x32xf32>
    %194 = math.exp %193 : vector<16x32xf32>
    %cst_65 = arith.constant 1.000000e+00 : f32
    %195 = vector.broadcast %cst_65 : f32 to vector<16x32xf32>
    %196 = arith.addf %195, %194 : vector<16x32xf32>
    %197 = arith.divf %195, %196 : vector<16x32xf32>
    %198 = arith.mulf %189, %140 : vector<16x32xf32>
    %199 = arith.mulf %183, %191 : vector<16x32xf32>
    %200 = arith.addf %198, %199 : vector<16x32xf32>
    %201 = math.tanh %200 : vector<16x32xf32>
    %202 = arith.mulf %197, %201 : vector<16x32xf32>
    %203 = arith.index_cast %c2_i32 : i32 to index
    %c0_66 = arith.constant 0 : index
    %c0_67 = arith.constant 0 : index
    %204 = vector.load %arg7[%203, %c0_66, %c0_67] : memref<8x16x1xf32, #tpu.memory_space<vmem>>, vector<1x16x1xf32>
    %205 = vector.shape_cast %204 : vector<1x16x1xf32> to vector<16x1xf32>
    %206 = vector.shape_cast %205 : vector<16x1xf32> to vector<16x1xf32>
    %207 = vector.broadcast %206 : vector<16x1xf32> to vector<16x32xf32>
    %208 = arith.subf %202, %137 : vector<16x32xf32>
    %209 = arith.mulf %207, %208 : vector<16x32xf32>
    %210 = arith.addf %137, %209 : vector<16x32xf32>
    %211 = arith.subf %200, %140 : vector<16x32xf32>
    %212 = arith.mulf %207, %211 : vector<16x32xf32>
    %213 = arith.addf %140, %212 : vector<16x32xf32>
    %214 = arith.mulf %207, %202 : vector<16x32xf32>
    %215 = arith.truncf %214 : vector<16x32xf32> to vector<16x32xbf16>
    %cst_68 = arith.constant dense<0.000000e+00> : vector<16x256xf32>
    %216 = tpu.matmul %215, %14, %cst_68 {dimension_numbers = #tpu.dot_dimension_numbers<[1], [0], [0], [1], [0, 0, 1, 1], [], []>} : vector<16x32xbf16>, vector<32x256xbf16>, vector<16x256xf32> -> vector<16x256xf32>
    %217 = arith.index_cast %c2_i32 : i32 to index
    %c0_69 = arith.constant 0 : index
    %c0_70 = arith.constant 0 : index
    %218 = vector.load %arg8[%217, %c0_69, %c0_70] : memref<8x8x128xf32, #tpu.memory_space<vmem>>, vector<1x8x128xf32>
    %219 = vector.shape_cast %218 : vector<1x8x128xf32> to vector<8x128xf32>
    %220 = vector.extract_strided_slice %216 {offsets = [0, 0], sizes = [8, 128], strides = [1, 1]} : vector<16x256xf32> to vector<8x128xf32>
    %221 = arith.addf %219, %220 : vector<8x128xf32>
    %222 = arith.index_cast %c2_i32 : i32 to index
    %c0_71 = arith.constant 0 : index
    %c0_72 = arith.constant 0 : index
    %223 = vector.load %arg8[%222, %c0_71, %c0_72] : memref<8x8x128xf32, #tpu.memory_space<vmem>>, vector<1x8x128xf32>
    %224 = vector.shape_cast %223 : vector<1x8x128xf32> to vector<8x128xf32>
    %225 = vector.shape_cast %221 : vector<8x128xf32> to vector<1x8x128xf32>
    tpu.vector_store %arg8[%222, %c0_71, %c0_72], %225 {strides = array<i32>} : memref<8x8x128xf32, #tpu.memory_space<vmem>>, vector<1x8x128xf32>,
    %226 = arith.index_cast %162 : i32 to index
    %c0_73 = arith.constant 0 : index
    %c0_74 = arith.constant 0 : index
    %227 = vector.load %arg8[%226, %c0_73, %c0_74] : memref<8x8x128xf32, #tpu.memory_space<vmem>>, vector<1x8x128xf32>
    %228 = vector.shape_cast %227 : vector<1x8x128xf32> to vector<8x128xf32>
    %229 = vector.extract_strided_slice %216 {offsets = [8, 128], sizes = [8, 128], strides = [1, 1]} : vector<16x256xf32> to vector<8x128xf32>
    %230 = arith.addf %228, %229 : vector<8x128xf32>
    %231 = arith.index_cast %162 : i32 to index
    %c0_75 = arith.constant 0 : index
    %c0_76 = arith.constant 0 : index
    %232 = vector.load %arg8[%231, %c0_75, %c0_76] : memref<8x8x128xf32, #tpu.memory_space<vmem>>, vector<1x8x128xf32>
    %233 = vector.shape_cast %232 : vector<1x8x128xf32> to vector<8x128xf32>
    %234 = vector.shape_cast %230 : vector<8x128xf32> to vector<1x8x128xf32>
    tpu.vector_store %arg8[%231, %c0_75, %c0_76], %234 {strides = array<i32>} : memref<8x8x128xf32, #tpu.memory_space<vmem>>, vector<1x8x128xf32>,
    %c3_i32 = arith.constant 3 : i32
    %c7_i32_77 = arith.constant 7 : i32
    %235 = arith.subi %c7_i32_77, %c3_i32 : i32
    %236 = arith.truncf %210 : vector<16x32xf32> to vector<16x32xbf16>
    %cst_78 = arith.constant dense<0.000000e+00> : vector<16x256xf32>
    %237 = tpu.matmul %236, %13, %cst_78 {dimension_numbers = #tpu.dot_dimension_numbers<[1], [0], [0], [1], [0, 0, 1, 1], [], []>} : vector<16x32xbf16>, vector<32x256xbf16>, vector<16x256xf32> -> vector<16x256xf32>
    %238 = arith.index_cast %c3_i32 : i32 to index
    %c0_79 = arith.constant 0 : index
    %c0_80 = arith.constant 0 : index
    %239 = vector.load %arg9[%238, %c0_79, %c0_80] : memref<8x8x256xf32, #tpu.memory_space<vmem>>, vector<1x8x256xf32>
    %240 = vector.shape_cast %239 : vector<1x8x256xf32> to vector<8x256xf32>
    %241 = arith.index_cast %235 : i32 to index
    %c0_81 = arith.constant 0 : index
    %c0_82 = arith.constant 0 : index
    %242 = vector.load %arg9[%241, %c0_81, %c0_82] : memref<8x8x256xf32, #tpu.memory_space<vmem>>, vector<1x8x256xf32>
    %243 = vector.shape_cast %242 : vector<1x8x256xf32> to vector<8x256xf32>
    %244 = vector.extract_strided_slice %240 {offsets = [0, 0], sizes = [8, 128], strides = [1, 1]} : vector<8x256xf32> to vector<8x128xf32>
    %245 = vector.extract_strided_slice %237 {offsets = [0, 0], sizes = [8, 128], strides = [1, 1]} : vector<16x256xf32> to vector<8x128xf32>
    %246 = arith.addf %244, %245 : vector<8x128xf32>
    %247 = vector.extract_strided_slice %243 {offsets = [0, 128], sizes = [8, 128], strides = [1, 1]} : vector<8x256xf32> to vector<8x128xf32>
    %248 = vector.extract_strided_slice %237 {offsets = [8, 128], sizes = [8, 128], strides = [1, 1]} : vector<16x256xf32> to vector<8x128xf32>
    %249 = arith.addf %247, %248 : vector<8x128xf32>
    %250 = tpu.concatenate %246, %249 in 0 : vector<8x128xf32>, vector<8x128xf32> -> vector<16x128xf32>
    %251 = vector.extract_strided_slice %250 {offsets = [0, 0], sizes = [16, 32], strides = [1, 1]} : vector<16x128xf32> to vector<16x32xf32>
    %252 = arith.negf %251 : vector<16x32xf32>
    %253 = math.exp %252 : vector<16x32xf32>
    %cst_83 = arith.constant 1.000000e+00 : f32
    %254 = vector.broadcast %cst_83 : f32 to vector<16x32xf32>
    %255 = arith.addf %254, %253 : vector<16x32xf32>
    %256 = arith.divf %254, %255 : vector<16x32xf32>
    %257 = vector.extract_strided_slice %250 {offsets = [0, 32], sizes = [16, 32], strides = [1, 1]} : vector<16x128xf32> to vector<16x32xf32>
    %258 = arith.negf %257 : vector<16x32xf32>
    %259 = math.exp %258 : vector<16x32xf32>
    %cst_84 = arith.constant 1.000000e+00 : f32
    %260 = vector.broadcast %cst_84 : f32 to vector<16x32xf32>
    %261 = arith.addf %260, %259 : vector<16x32xf32>
    %262 = arith.divf %260, %261 : vector<16x32xf32>
    %263 = vector.extract_strided_slice %250 {offsets = [0, 64], sizes = [16, 32], strides = [1, 1]} : vector<16x128xf32> to vector<16x32xf32>
    %264 = math.tanh %263 : vector<16x32xf32>
    %265 = vector.extract_strided_slice %250 {offsets = [0, 96], sizes = [16, 32], strides = [1, 1]} : vector<16x128xf32> to vector<16x32xf32>
    %266 = arith.negf %265 : vector<16x32xf32>
    %267 = math.exp %266 : vector<16x32xf32>
    %cst_85 = arith.constant 1.000000e+00 : f32
    %268 = vector.broadcast %cst_85 : f32 to vector<16x32xf32>
    %269 = arith.addf %268, %267 : vector<16x32xf32>
    %270 = arith.divf %268, %269 : vector<16x32xf32>
    %271 = arith.mulf %262, %213 : vector<16x32xf32>
    %272 = arith.mulf %256, %264 : vector<16x32xf32>
    %273 = arith.addf %271, %272 : vector<16x32xf32>
    %274 = math.tanh %273 : vector<16x32xf32>
    %275 = arith.mulf %270, %274 : vector<16x32xf32>
    %276 = arith.index_cast %c3_i32 : i32 to index
    %c0_86 = arith.constant 0 : index
    %c0_87 = arith.constant 0 : index
    %277 = vector.load %arg7[%276, %c0_86, %c0_87] : memref<8x16x1xf32, #tpu.memory_space<vmem>>, vector<1x16x1xf32>
    %278 = vector.shape_cast %277 : vector<1x16x1xf32> to vector<16x1xf32>
    %279 = vector.shape_cast %278 : vector<16x1xf32> to vector<16x1xf32>
    %280 = vector.broadcast %279 : vector<16x1xf32> to vector<16x32xf32>
    %281 = arith.subf %275, %210 : vector<16x32xf32>
    %282 = arith.mulf %280, %281 : vector<16x32xf32>
    %283 = arith.addf %210, %282 : vector<16x32xf32>
    %284 = arith.subf %273, %213 : vector<16x32xf32>
    %285 = arith.mulf %280, %284 : vector<16x32xf32>
    %286 = arith.addf %213, %285 : vector<16x32xf32>
    %287 = arith.mulf %280, %275 : vector<16x32xf32>
    %288 = arith.truncf %287 : vector<16x32xf32> to vector<16x32xbf16>
    %cst_88 = arith.constant dense<0.000000e+00> : vector<16x256xf32>
    %289 = tpu.matmul %288, %14, %cst_88 {dimension_numbers = #tpu.dot_dimension_numbers<[1], [0], [0], [1], [0, 0, 1, 1], [], []>} : vector<16x32xbf16>, vector<32x256xbf16>, vector<16x256xf32> -> vector<16x256xf32>
    %290 = arith.index_cast %c3_i32 : i32 to index
    %c0_89 = arith.constant 0 : index
    %c0_90 = arith.constant 0 : index
    %291 = vector.load %arg8[%290, %c0_89, %c0_90] : memref<8x8x128xf32, #tpu.memory_space<vmem>>, vector<1x8x128xf32>
    %292 = vector.shape_cast %291 : vector<1x8x128xf32> to vector<8x128xf32>
    %293 = vector.extract_strided_slice %289 {offsets = [0, 0], sizes = [8, 128], strides = [1, 1]} : vector<16x256xf32> to vector<8x128xf32>
    %294 = arith.addf %292, %293 : vector<8x128xf32>
    %295 = arith.index_cast %c3_i32 : i32 to index
    %c0_91 = arith.constant 0 : index
    %c0_92 = arith.constant 0 : index
    %296 = vector.load %arg8[%295, %c0_91, %c0_92] : memref<8x8x128xf32, #tpu.memory_space<vmem>>, vector<1x8x128xf32>
    %297 = vector.shape_cast %296 : vector<1x8x128xf32> to vector<8x128xf32>
    %298 = vector.shape_cast %294 : vector<8x128xf32> to vector<1x8x128xf32>
    tpu.vector_store %arg8[%295, %c0_91, %c0_92], %298 {strides = array<i32>} : memref<8x8x128xf32, #tpu.memory_space<vmem>>, vector<1x8x128xf32>,
    %299 = arith.index_cast %235 : i32 to index
    %c0_93 = arith.constant 0 : index
    %c0_94 = arith.constant 0 : index
    %300 = vector.load %arg8[%299, %c0_93, %c0_94] : memref<8x8x128xf32, #tpu.memory_space<vmem>>, vector<1x8x128xf32>
    %301 = vector.shape_cast %300 : vector<1x8x128xf32> to vector<8x128xf32>
    %302 = vector.extract_strided_slice %289 {offsets = [8, 128], sizes = [8, 128], strides = [1, 1]} : vector<16x256xf32> to vector<8x128xf32>
    %303 = arith.addf %301, %302 : vector<8x128xf32>
    %304 = arith.index_cast %235 : i32 to index
    %c0_95 = arith.constant 0 : index
    %c0_96 = arith.constant 0 : index
    %305 = vector.load %arg8[%304, %c0_95, %c0_96] : memref<8x8x128xf32, #tpu.memory_space<vmem>>, vector<1x8x128xf32>
    %306 = vector.shape_cast %305 : vector<1x8x128xf32> to vector<8x128xf32>
    %307 = vector.shape_cast %303 : vector<8x128xf32> to vector<1x8x128xf32>
    tpu.vector_store %arg8[%304, %c0_95, %c0_96], %307 {strides = array<i32>} : memref<8x8x128xf32, #tpu.memory_space<vmem>>, vector<1x8x128xf32>,
    %c4_i32 = arith.constant 4 : i32
    %c7_i32_97 = arith.constant 7 : i32
    %308 = arith.subi %c7_i32_97, %c4_i32 : i32
    %309 = arith.truncf %283 : vector<16x32xf32> to vector<16x32xbf16>
    %cst_98 = arith.constant dense<0.000000e+00> : vector<16x256xf32>
    %310 = tpu.matmul %309, %13, %cst_98 {dimension_numbers = #tpu.dot_dimension_numbers<[1], [0], [0], [1], [0, 0, 1, 1], [], []>} : vector<16x32xbf16>, vector<32x256xbf16>, vector<16x256xf32> -> vector<16x256xf32>
    %311 = arith.index_cast %c4_i32 : i32 to index
    %c0_99 = arith.constant 0 : index
    %c0_100 = arith.constant 0 : index
    %312 = vector.load %arg9[%311, %c0_99, %c0_100] : memref<8x8x256xf32, #tpu.memory_space<vmem>>, vector<1x8x256xf32>
    %313 = vector.shape_cast %312 : vector<1x8x256xf32> to vector<8x256xf32>
    %314 = arith.index_cast %308 : i32 to index
    %c0_101 = arith.constant 0 : index
    %c0_102 = arith.constant 0 : index
    %315 = vector.load %arg9[%314, %c0_101, %c0_102] : memref<8x8x256xf32, #tpu.memory_space<vmem>>, vector<1x8x256xf32>
    %316 = vector.shape_cast %315 : vector<1x8x256xf32> to vector<8x256xf32>
    %317 = vector.extract_strided_slice %313 {offsets = [0, 0], sizes = [8, 128], strides = [1, 1]} : vector<8x256xf32> to vector<8x128xf32>
    %318 = vector.extract_strided_slice %310 {offsets = [0, 0], sizes = [8, 128], strides = [1, 1]} : vector<16x256xf32> to vector<8x128xf32>
    %319 = arith.addf %317, %318 : vector<8x128xf32>
    %320 = vector.extract_strided_slice %316 {offsets = [0, 128], sizes = [8, 128], strides = [1, 1]} : vector<8x256xf32> to vector<8x128xf32>
    %321 = vector.extract_strided_slice %310 {offsets = [8, 128], sizes = [8, 128], strides = [1, 1]} : vector<16x256xf32> to vector<8x128xf32>
    %322 = arith.addf %320, %321 : vector<8x128xf32>
    %323 = tpu.concatenate %319, %322 in 0 : vector<8x128xf32>, vector<8x128xf32> -> vector<16x128xf32>
    %324 = vector.extract_strided_slice %323 {offsets = [0, 0], sizes = [16, 32], strides = [1, 1]} : vector<16x128xf32> to vector<16x32xf32>
    %325 = arith.negf %324 : vector<16x32xf32>
    %326 = math.exp %325 : vector<16x32xf32>
    %cst_103 = arith.constant 1.000000e+00 : f32
    %327 = vector.broadcast %cst_103 : f32 to vector<16x32xf32>
    %328 = arith.addf %327, %326 : vector<16x32xf32>
    %329 = arith.divf %327, %328 : vector<16x32xf32>
    %330 = vector.extract_strided_slice %323 {offsets = [0, 32], sizes = [16, 32], strides = [1, 1]} : vector<16x128xf32> to vector<16x32xf32>
    %331 = arith.negf %330 : vector<16x32xf32>
    %332 = math.exp %331 : vector<16x32xf32>
    %cst_104 = arith.constant 1.000000e+00 : f32
    %333 = vector.broadcast %cst_104 : f32 to vector<16x32xf32>
    %334 = arith.addf %333, %332 : vector<16x32xf32>
    %335 = arith.divf %333, %334 : vector<16x32xf32>
    %336 = vector.extract_strided_slice %323 {offsets = [0, 64], sizes = [16, 32], strides = [1, 1]} : vector<16x128xf32> to vector<16x32xf32>
    %337 = math.tanh %336 : vector<16x32xf32>
    %338 = vector.extract_strided_slice %323 {offsets = [0, 96], sizes = [16, 32], strides = [1, 1]} : vector<16x128xf32> to vector<16x32xf32>
    %339 = arith.negf %338 : vector<16x32xf32>
    %340 = math.exp %339 : vector<16x32xf32>
    %cst_105 = arith.constant 1.000000e+00 : f32
    %341 = vector.broadcast %cst_105 : f32 to vector<16x32xf32>
    %342 = arith.addf %341, %340 : vector<16x32xf32>
    %343 = arith.divf %341, %342 : vector<16x32xf32>
    %344 = arith.mulf %335, %286 : vector<16x32xf32>
    %345 = arith.mulf %329, %337 : vector<16x32xf32>
    %346 = arith.addf %344, %345 : vector<16x32xf32>
    %347 = math.tanh %346 : vector<16x32xf32>
    %348 = arith.mulf %343, %347 : vector<16x32xf32>
    %349 = arith.index_cast %c4_i32 : i32 to index
    %c0_106 = arith.constant 0 : index
    %c0_107 = arith.constant 0 : index
    %350 = vector.load %arg7[%349, %c0_106, %c0_107] : memref<8x16x1xf32, #tpu.memory_space<vmem>>, vector<1x16x1xf32>
    %351 = vector.shape_cast %350 : vector<1x16x1xf32> to vector<16x1xf32>
    %352 = vector.shape_cast %351 : vector<16x1xf32> to vector<16x1xf32>
    %353 = vector.broadcast %352 : vector<16x1xf32> to vector<16x32xf32>
    %354 = arith.subf %348, %283 : vector<16x32xf32>
    %355 = arith.mulf %353, %354 : vector<16x32xf32>
    %356 = arith.addf %283, %355 : vector<16x32xf32>
    %357 = arith.subf %346, %286 : vector<16x32xf32>
    %358 = arith.mulf %353, %357 : vector<16x32xf32>
    %359 = arith.addf %286, %358 : vector<16x32xf32>
    %360 = arith.mulf %353, %348 : vector<16x32xf32>
    %361 = arith.truncf %360 : vector<16x32xf32> to vector<16x32xbf16>
    %cst_108 = arith.constant dense<0.000000e+00> : vector<16x256xf32>
    %362 = tpu.matmul %361, %14, %cst_108 {dimension_numbers = #tpu.dot_dimension_numbers<[1], [0], [0], [1], [0, 0, 1, 1], [], []>} : vector<16x32xbf16>, vector<32x256xbf16>, vector<16x256xf32> -> vector<16x256xf32>
    %363 = arith.index_cast %c4_i32 : i32 to index
    %c0_109 = arith.constant 0 : index
    %c0_110 = arith.constant 0 : index
    %364 = vector.load %arg8[%363, %c0_109, %c0_110] : memref<8x8x128xf32, #tpu.memory_space<vmem>>, vector<1x8x128xf32>
    %365 = vector.shape_cast %364 : vector<1x8x128xf32> to vector<8x128xf32>
    %366 = vector.extract_strided_slice %362 {offsets = [0, 0], sizes = [8, 128], strides = [1, 1]} : vector<16x256xf32> to vector<8x128xf32>
    %367 = arith.addf %365, %366 : vector<8x128xf32>
    %368 = arith.index_cast %c4_i32 : i32 to index
    %c0_111 = arith.constant 0 : index
    %c0_112 = arith.constant 0 : index
    %369 = vector.load %arg8[%368, %c0_111, %c0_112] : memref<8x8x128xf32, #tpu.memory_space<vmem>>, vector<1x8x128xf32>
    %370 = vector.shape_cast %369 : vector<1x8x128xf32> to vector<8x128xf32>
    %371 = vector.shape_cast %367 : vector<8x128xf32> to vector<1x8x128xf32>
    tpu.vector_store %arg8[%368, %c0_111, %c0_112], %371 {strides = array<i32>} : memref<8x8x128xf32, #tpu.memory_space<vmem>>, vector<1x8x128xf32>,
    %372 = arith.index_cast %308 : i32 to index
    %c0_113 = arith.constant 0 : index
    %c0_114 = arith.constant 0 : index
    %373 = vector.load %arg8[%372, %c0_113, %c0_114] : memref<8x8x128xf32, #tpu.memory_space<vmem>>, vector<1x8x128xf32>
    %374 = vector.shape_cast %373 : vector<1x8x128xf32> to vector<8x128xf32>
    %375 = vector.extract_strided_slice %362 {offsets = [8, 128], sizes = [8, 128], strides = [1, 1]} : vector<16x256xf32> to vector<8x128xf32>
    %376 = arith.addf %374, %375 : vector<8x128xf32>
    %377 = arith.index_cast %308 : i32 to index
    %c0_115 = arith.constant 0 : index
    %c0_116 = arith.constant 0 : index
    %378 = vector.load %arg8[%377, %c0_115, %c0_116] : memref<8x8x128xf32, #tpu.memory_space<vmem>>, vector<1x8x128xf32>
    %379 = vector.shape_cast %378 : vector<1x8x128xf32> to vector<8x128xf32>
    %380 = vector.shape_cast %376 : vector<8x128xf32> to vector<1x8x128xf32>
    tpu.vector_store %arg8[%377, %c0_115, %c0_116], %380 {strides = array<i32>} : memref<8x8x128xf32, #tpu.memory_space<vmem>>, vector<1x8x128xf32>,
    %c5_i32 = arith.constant 5 : i32
    %c7_i32_117 = arith.constant 7 : i32
    %381 = arith.subi %c7_i32_117, %c5_i32 : i32
    %382 = arith.truncf %356 : vector<16x32xf32> to vector<16x32xbf16>
    %cst_118 = arith.constant dense<0.000000e+00> : vector<16x256xf32>
    %383 = tpu.matmul %382, %13, %cst_118 {dimension_numbers = #tpu.dot_dimension_numbers<[1], [0], [0], [1], [0, 0, 1, 1], [], []>} : vector<16x32xbf16>, vector<32x256xbf16>, vector<16x256xf32> -> vector<16x256xf32>
    %384 = arith.index_cast %c5_i32 : i32 to index
    %c0_119 = arith.constant 0 : index
    %c0_120 = arith.constant 0 : index
    %385 = vector.load %arg9[%384, %c0_119, %c0_120] : memref<8x8x256xf32, #tpu.memory_space<vmem>>, vector<1x8x256xf32>
    %386 = vector.shape_cast %385 : vector<1x8x256xf32> to vector<8x256xf32>
    %387 = arith.index_cast %381 : i32 to index
    %c0_121 = arith.constant 0 : index
    %c0_122 = arith.constant 0 : index
    %388 = vector.load %arg9[%387, %c0_121, %c0_122] : memref<8x8x256xf32, #tpu.memory_space<vmem>>, vector<1x8x256xf32>
    %389 = vector.shape_cast %388 : vector<1x8x256xf32> to vector<8x256xf32>
    %390 = vector.extract_strided_slice %386 {offsets = [0, 0], sizes = [8, 128], strides = [1, 1]} : vector<8x256xf32> to vector<8x128xf32>
    %391 = vector.extract_strided_slice %383 {offsets = [0, 0], sizes = [8, 128], strides = [1, 1]} : vector<16x256xf32> to vector<8x128xf32>
    %392 = arith.addf %390, %391 : vector<8x128xf32>
    %393 = vector.extract_strided_slice %389 {offsets = [0, 128], sizes = [8, 128], strides = [1, 1]} : vector<8x256xf32> to vector<8x128xf32>
    %394 = vector.extract_strided_slice %383 {offsets = [8, 128], sizes = [8, 128], strides = [1, 1]} : vector<16x256xf32> to vector<8x128xf32>
    %395 = arith.addf %393, %394 : vector<8x128xf32>
    %396 = tpu.concatenate %392, %395 in 0 : vector<8x128xf32>, vector<8x128xf32> -> vector<16x128xf32>
    %397 = vector.extract_strided_slice %396 {offsets = [0, 0], sizes = [16, 32], strides = [1, 1]} : vector<16x128xf32> to vector<16x32xf32>
    %398 = arith.negf %397 : vector<16x32xf32>
    %399 = math.exp %398 : vector<16x32xf32>
    %cst_123 = arith.constant 1.000000e+00 : f32
    %400 = vector.broadcast %cst_123 : f32 to vector<16x32xf32>
    %401 = arith.addf %400, %399 : vector<16x32xf32>
    %402 = arith.divf %400, %401 : vector<16x32xf32>
    %403 = vector.extract_strided_slice %396 {offsets = [0, 32], sizes = [16, 32], strides = [1, 1]} : vector<16x128xf32> to vector<16x32xf32>
    %404 = arith.negf %403 : vector<16x32xf32>
    %405 = math.exp %404 : vector<16x32xf32>
    %cst_124 = arith.constant 1.000000e+00 : f32
    %406 = vector.broadcast %cst_124 : f32 to vector<16x32xf32>
    %407 = arith.addf %406, %405 : vector<16x32xf32>
    %408 = arith.divf %406, %407 : vector<16x32xf32>
    %409 = vector.extract_strided_slice %396 {offsets = [0, 64], sizes = [16, 32], strides = [1, 1]} : vector<16x128xf32> to vector<16x32xf32>
    %410 = math.tanh %409 : vector<16x32xf32>
    %411 = vector.extract_strided_slice %396 {offsets = [0, 96], sizes = [16, 32], strides = [1, 1]} : vector<16x128xf32> to vector<16x32xf32>
    %412 = arith.negf %411 : vector<16x32xf32>
    %413 = math.exp %412 : vector<16x32xf32>
    %cst_125 = arith.constant 1.000000e+00 : f32
    %414 = vector.broadcast %cst_125 : f32 to vector<16x32xf32>
    %415 = arith.addf %414, %413 : vector<16x32xf32>
    %416 = arith.divf %414, %415 : vector<16x32xf32>
    %417 = arith.mulf %408, %359 : vector<16x32xf32>
    %418 = arith.mulf %402, %410 : vector<16x32xf32>
    %419 = arith.addf %417, %418 : vector<16x32xf32>
    %420 = math.tanh %419 : vector<16x32xf32>
    %421 = arith.mulf %416, %420 : vector<16x32xf32>
    %422 = arith.index_cast %c5_i32 : i32 to index
    %c0_126 = arith.constant 0 : index
    %c0_127 = arith.constant 0 : index
    %423 = vector.load %arg7[%422, %c0_126, %c0_127] : memref<8x16x1xf32, #tpu.memory_space<vmem>>, vector<1x16x1xf32>
    %424 = vector.shape_cast %423 : vector<1x16x1xf32> to vector<16x1xf32>
    %425 = vector.shape_cast %424 : vector<16x1xf32> to vector<16x1xf32>
    %426 = vector.broadcast %425 : vector<16x1xf32> to vector<16x32xf32>
    %427 = arith.subf %421, %356 : vector<16x32xf32>
    %428 = arith.mulf %426, %427 : vector<16x32xf32>
    %429 = arith.addf %356, %428 : vector<16x32xf32>
    %430 = arith.subf %419, %359 : vector<16x32xf32>
    %431 = arith.mulf %426, %430 : vector<16x32xf32>
    %432 = arith.addf %359, %431 : vector<16x32xf32>
    %433 = arith.mulf %426, %421 : vector<16x32xf32>
    %434 = arith.truncf %433 : vector<16x32xf32> to vector<16x32xbf16>
    %cst_128 = arith.constant dense<0.000000e+00> : vector<16x256xf32>
    %435 = tpu.matmul %434, %14, %cst_128 {dimension_numbers = #tpu.dot_dimension_numbers<[1], [0], [0], [1], [0, 0, 1, 1], [], []>} : vector<16x32xbf16>, vector<32x256xbf16>, vector<16x256xf32> -> vector<16x256xf32>
    %436 = arith.index_cast %c5_i32 : i32 to index
    %c0_129 = arith.constant 0 : index
    %c0_130 = arith.constant 0 : index
    %437 = vector.load %arg8[%436, %c0_129, %c0_130] : memref<8x8x128xf32, #tpu.memory_space<vmem>>, vector<1x8x128xf32>
    %438 = vector.shape_cast %437 : vector<1x8x128xf32> to vector<8x128xf32>
    %439 = vector.extract_strided_slice %435 {offsets = [0, 0], sizes = [8, 128], strides = [1, 1]} : vector<16x256xf32> to vector<8x128xf32>
    %440 = arith.addf %438, %439 : vector<8x128xf32>
    %441 = arith.index_cast %c5_i32 : i32 to index
    %c0_131 = arith.constant 0 : index
    %c0_132 = arith.constant 0 : index
    %442 = vector.load %arg8[%441, %c0_131, %c0_132] : memref<8x8x128xf32, #tpu.memory_space<vmem>>, vector<1x8x128xf32>
    %443 = vector.shape_cast %442 : vector<1x8x128xf32> to vector<8x128xf32>
    %444 = vector.shape_cast %440 : vector<8x128xf32> to vector<1x8x128xf32>
    tpu.vector_store %arg8[%441, %c0_131, %c0_132], %444 {strides = array<i32>} : memref<8x8x128xf32, #tpu.memory_space<vmem>>, vector<1x8x128xf32>,
    %445 = arith.index_cast %381 : i32 to index
    %c0_133 = arith.constant 0 : index
    %c0_134 = arith.constant 0 : index
    %446 = vector.load %arg8[%445, %c0_133, %c0_134] : memref<8x8x128xf32, #tpu.memory_space<vmem>>, vector<1x8x128xf32>
    %447 = vector.shape_cast %446 : vector<1x8x128xf32> to vector<8x128xf32>
    %448 = vector.extract_strided_slice %435 {offsets = [8, 128], sizes = [8, 128], strides = [1, 1]} : vector<16x256xf32> to vector<8x128xf32>
    %449 = arith.addf %447, %448 : vector<8x128xf32>
    %450 = arith.index_cast %381 : i32 to index
    %c0_135 = arith.constant 0 : index
    %c0_136 = arith.constant 0 : index
    %451 = vector.load %arg8[%450, %c0_135, %c0_136] : memref<8x8x128xf32, #tpu.memory_space<vmem>>, vector<1x8x128xf32>
    %452 = vector.shape_cast %451 : vector<1x8x128xf32> to vector<8x128xf32>
    %453 = vector.shape_cast %449 : vector<8x128xf32> to vector<1x8x128xf32>
    tpu.vector_store %arg8[%450, %c0_135, %c0_136], %453 {strides = array<i32>} : memref<8x8x128xf32, #tpu.memory_space<vmem>>, vector<1x8x128xf32>,
    %c6_i32 = arith.constant 6 : i32
    %c7_i32_137 = arith.constant 7 : i32
    %454 = arith.subi %c7_i32_137, %c6_i32 : i32
    %455 = arith.truncf %429 : vector<16x32xf32> to vector<16x32xbf16>
    %cst_138 = arith.constant dense<0.000000e+00> : vector<16x256xf32>
    %456 = tpu.matmul %455, %13, %cst_138 {dimension_numbers = #tpu.dot_dimension_numbers<[1], [0], [0], [1], [0, 0, 1, 1], [], []>} : vector<16x32xbf16>, vector<32x256xbf16>, vector<16x256xf32> -> vector<16x256xf32>
    %457 = arith.index_cast %c6_i32 : i32 to index
    %c0_139 = arith.constant 0 : index
    %c0_140 = arith.constant 0 : index
    %458 = vector.load %arg9[%457, %c0_139, %c0_140] : memref<8x8x256xf32, #tpu.memory_space<vmem>>, vector<1x8x256xf32>
    %459 = vector.shape_cast %458 : vector<1x8x256xf32> to vector<8x256xf32>
    %460 = arith.index_cast %454 : i32 to index
    %c0_141 = arith.constant 0 : index
    %c0_142 = arith.constant 0 : index
    %461 = vector.load %arg9[%460, %c0_141, %c0_142] : memref<8x8x256xf32, #tpu.memory_space<vmem>>, vector<1x8x256xf32>
    %462 = vector.shape_cast %461 : vector<1x8x256xf32> to vector<8x256xf32>
    %463 = vector.extract_strided_slice %459 {offsets = [0, 0], sizes = [8, 128], strides = [1, 1]} : vector<8x256xf32> to vector<8x128xf32>
    %464 = vector.extract_strided_slice %456 {offsets = [0, 0], sizes = [8, 128], strides = [1, 1]} : vector<16x256xf32> to vector<8x128xf32>
    %465 = arith.addf %463, %464 : vector<8x128xf32>
    %466 = vector.extract_strided_slice %462 {offsets = [0, 128], sizes = [8, 128], strides = [1, 1]} : vector<8x256xf32> to vector<8x128xf32>
    %467 = vector.extract_strided_slice %456 {offsets = [8, 128], sizes = [8, 128], strides = [1, 1]} : vector<16x256xf32> to vector<8x128xf32>
    %468 = arith.addf %466, %467 : vector<8x128xf32>
    %469 = tpu.concatenate %465, %468 in 0 : vector<8x128xf32>, vector<8x128xf32> -> vector<16x128xf32>
    %470 = vector.extract_strided_slice %469 {offsets = [0, 0], sizes = [16, 32], strides = [1, 1]} : vector<16x128xf32> to vector<16x32xf32>
    %471 = arith.negf %470 : vector<16x32xf32>
    %472 = math.exp %471 : vector<16x32xf32>
    %cst_143 = arith.constant 1.000000e+00 : f32
    %473 = vector.broadcast %cst_143 : f32 to vector<16x32xf32>
    %474 = arith.addf %473, %472 : vector<16x32xf32>
    %475 = arith.divf %473, %474 : vector<16x32xf32>
    %476 = vector.extract_strided_slice %469 {offsets = [0, 32], sizes = [16, 32], strides = [1, 1]} : vector<16x128xf32> to vector<16x32xf32>
    %477 = arith.negf %476 : vector<16x32xf32>
    %478 = math.exp %477 : vector<16x32xf32>
    %cst_144 = arith.constant 1.000000e+00 : f32
    %479 = vector.broadcast %cst_144 : f32 to vector<16x32xf32>
    %480 = arith.addf %479, %478 : vector<16x32xf32>
    %481 = arith.divf %479, %480 : vector<16x32xf32>
    %482 = vector.extract_strided_slice %469 {offsets = [0, 64], sizes = [16, 32], strides = [1, 1]} : vector<16x128xf32> to vector<16x32xf32>
    %483 = math.tanh %482 : vector<16x32xf32>
    %484 = vector.extract_strided_slice %469 {offsets = [0, 96], sizes = [16, 32], strides = [1, 1]} : vector<16x128xf32> to vector<16x32xf32>
    %485 = arith.negf %484 : vector<16x32xf32>
    %486 = math.exp %485 : vector<16x32xf32>
    %cst_145 = arith.constant 1.000000e+00 : f32
    %487 = vector.broadcast %cst_145 : f32 to vector<16x32xf32>
    %488 = arith.addf %487, %486 : vector<16x32xf32>
    %489 = arith.divf %487, %488 : vector<16x32xf32>
    %490 = arith.mulf %481, %432 : vector<16x32xf32>
    %491 = arith.mulf %475, %483 : vector<16x32xf32>
    %492 = arith.addf %490, %491 : vector<16x32xf32>
    %493 = math.tanh %492 : vector<16x32xf32>
    %494 = arith.mulf %489, %493 : vector<16x32xf32>
    %495 = arith.index_cast %c6_i32 : i32 to index
    %c0_146 = arith.constant 0 : index
    %c0_147 = arith.constant 0 : index
    %496 = vector.load %arg7[%495, %c0_146, %c0_147] : memref<8x16x1xf32, #tpu.memory_space<vmem>>, vector<1x16x1xf32>
    %497 = vector.shape_cast %496 : vector<1x16x1xf32> to vector<16x1xf32>
    %498 = vector.shape_cast %497 : vector<16x1xf32> to vector<16x1xf32>
    %499 = vector.broadcast %498 : vector<16x1xf32> to vector<16x32xf32>
    %500 = arith.subf %494, %429 : vector<16x32xf32>
    %501 = arith.mulf %499, %500 : vector<16x32xf32>
    %502 = arith.addf %429, %501 : vector<16x32xf32>
    %503 = arith.subf %492, %432 : vector<16x32xf32>
    %504 = arith.mulf %499, %503 : vector<16x32xf32>
    %505 = arith.addf %432, %504 : vector<16x32xf32>
    %506 = arith.mulf %499, %494 : vector<16x32xf32>
    %507 = arith.truncf %506 : vector<16x32xf32> to vector<16x32xbf16>
    %cst_148 = arith.constant dense<0.000000e+00> : vector<16x256xf32>
    %508 = tpu.matmul %507, %14, %cst_148 {dimension_numbers = #tpu.dot_dimension_numbers<[1], [0], [0], [1], [0, 0, 1, 1], [], []>} : vector<16x32xbf16>, vector<32x256xbf16>, vector<16x256xf32> -> vector<16x256xf32>
    %509 = arith.index_cast %c6_i32 : i32 to index
    %c0_149 = arith.constant 0 : index
    %c0_150 = arith.constant 0 : index
    %510 = vector.load %arg8[%509, %c0_149, %c0_150] : memref<8x8x128xf32, #tpu.memory_space<vmem>>, vector<1x8x128xf32>
    %511 = vector.shape_cast %510 : vector<1x8x128xf32> to vector<8x128xf32>
    %512 = vector.extract_strided_slice %508 {offsets = [0, 0], sizes = [8, 128], strides = [1, 1]} : vector<16x256xf32> to vector<8x128xf32>
    %513 = arith.addf %511, %512 : vector<8x128xf32>
    %514 = arith.index_cast %c6_i32 : i32 to index
    %c0_151 = arith.constant 0 : index
    %c0_152 = arith.constant 0 : index
    %515 = vector.load %arg8[%514, %c0_151, %c0_152] : memref<8x8x128xf32, #tpu.memory_space<vmem>>, vector<1x8x128xf32>
    %516 = vector.shape_cast %515 : vector<1x8x128xf32> to vector<8x128xf32>
    %517 = vector.shape_cast %513 : vector<8x128xf32> to vector<1x8x128xf32>
    tpu.vector_store %arg8[%514, %c0_151, %c0_152], %517 {strides = array<i32>} : memref<8x8x128xf32, #tpu.memory_space<vmem>>, vector<1x8x128xf32>,
    %518 = arith.index_cast %454 : i32 to index
    %c0_153 = arith.constant 0 : index
    %c0_154 = arith.constant 0 : index
    %519 = vector.load %arg8[%518, %c0_153, %c0_154] : memref<8x8x128xf32, #tpu.memory_space<vmem>>, vector<1x8x128xf32>
    %520 = vector.shape_cast %519 : vector<1x8x128xf32> to vector<8x128xf32>
    %521 = vector.extract_strided_slice %508 {offsets = [8, 128], sizes = [8, 128], strides = [1, 1]} : vector<16x256xf32> to vector<8x128xf32>
    %522 = arith.addf %520, %521 : vector<8x128xf32>
    %523 = arith.index_cast %454 : i32 to index
    %c0_155 = arith.constant 0 : index
    %c0_156 = arith.constant 0 : index
    %524 = vector.load %arg8[%523, %c0_155, %c0_156] : memref<8x8x128xf32, #tpu.memory_space<vmem>>, vector<1x8x128xf32>
    %525 = vector.shape_cast %524 : vector<1x8x128xf32> to vector<8x128xf32>
    %526 = vector.shape_cast %522 : vector<8x128xf32> to vector<1x8x128xf32>
    tpu.vector_store %arg8[%523, %c0_155, %c0_156], %526 {strides = array<i32>} : memref<8x8x128xf32, #tpu.memory_space<vmem>>, vector<1x8x128xf32>,
    %c7_i32_157 = arith.constant 7 : i32
    %c7_i32_158 = arith.constant 7 : i32
    %527 = arith.subi %c7_i32_158, %c7_i32_157 : i32
    %528 = arith.truncf %502 : vector<16x32xf32> to vector<16x32xbf16>
    %cst_159 = arith.constant dense<0.000000e+00> : vector<16x256xf32>
    %529 = tpu.matmul %528, %13, %cst_159 {dimension_numbers = #tpu.dot_dimension_numbers<[1], [0], [0], [1], [0, 0, 1, 1], [], []>} : vector<16x32xbf16>, vector<32x256xbf16>, vector<16x256xf32> -> vector<16x256xf32>
    %530 = arith.index_cast %c7_i32_157 : i32 to index
    %c0_160 = arith.constant 0 : index
    %c0_161 = arith.constant 0 : index
    %531 = vector.load %arg9[%530, %c0_160, %c0_161] : memref<8x8x256xf32, #tpu.memory_space<vmem>>, vector<1x8x256xf32>
    %532 = vector.shape_cast %531 : vector<1x8x256xf32> to vector<8x256xf32>
    %533 = arith.index_cast %527 : i32 to index
    %c0_162 = arith.constant 0 : index
    %c0_163 = arith.constant 0 : index
    %534 = vector.load %arg9[%533, %c0_162, %c0_163] : memref<8x8x256xf32, #tpu.memory_space<vmem>>, vector<1x8x256xf32>
    %535 = vector.shape_cast %534 : vector<1x8x256xf32> to vector<8x256xf32>
    %536 = vector.extract_strided_slice %532 {offsets = [0, 0], sizes = [8, 128], strides = [1, 1]} : vector<8x256xf32> to vector<8x128xf32>
    %537 = vector.extract_strided_slice %529 {offsets = [0, 0], sizes = [8, 128], strides = [1, 1]} : vector<16x256xf32> to vector<8x128xf32>
    %538 = arith.addf %536, %537 : vector<8x128xf32>
    %539 = vector.extract_strided_slice %535 {offsets = [0, 128], sizes = [8, 128], strides = [1, 1]} : vector<8x256xf32> to vector<8x128xf32>
    %540 = vector.extract_strided_slice %529 {offsets = [8, 128], sizes = [8, 128], strides = [1, 1]} : vector<16x256xf32> to vector<8x128xf32>
    %541 = arith.addf %539, %540 : vector<8x128xf32>
    %542 = tpu.concatenate %538, %541 in 0 : vector<8x128xf32>, vector<8x128xf32> -> vector<16x128xf32>
    %543 = vector.extract_strided_slice %542 {offsets = [0, 0], sizes = [16, 32], strides = [1, 1]} : vector<16x128xf32> to vector<16x32xf32>
    %544 = arith.negf %543 : vector<16x32xf32>
    %545 = math.exp %544 : vector<16x32xf32>
    %cst_164 = arith.constant 1.000000e+00 : f32
    %546 = vector.broadcast %cst_164 : f32 to vector<16x32xf32>
    %547 = arith.addf %546, %545 : vector<16x32xf32>
    %548 = arith.divf %546, %547 : vector<16x32xf32>
    %549 = vector.extract_strided_slice %542 {offsets = [0, 32], sizes = [16, 32], strides = [1, 1]} : vector<16x128xf32> to vector<16x32xf32>
    %550 = arith.negf %549 : vector<16x32xf32>
    %551 = math.exp %550 : vector<16x32xf32>
    %cst_165 = arith.constant 1.000000e+00 : f32
    %552 = vector.broadcast %cst_165 : f32 to vector<16x32xf32>
    %553 = arith.addf %552, %551 : vector<16x32xf32>
    %554 = arith.divf %552, %553 : vector<16x32xf32>
    %555 = vector.extract_strided_slice %542 {offsets = [0, 64], sizes = [16, 32], strides = [1, 1]} : vector<16x128xf32> to vector<16x32xf32>
    %556 = math.tanh %555 : vector<16x32xf32>
    %557 = vector.extract_strided_slice %542 {offsets = [0, 96], sizes = [16, 32], strides = [1, 1]} : vector<16x128xf32> to vector<16x32xf32>
    %558 = arith.negf %557 : vector<16x32xf32>
    %559 = math.exp %558 : vector<16x32xf32>
    %cst_166 = arith.constant 1.000000e+00 : f32
    %560 = vector.broadcast %cst_166 : f32 to vector<16x32xf32>
    %561 = arith.addf %560, %559 : vector<16x32xf32>
    %562 = arith.divf %560, %561 : vector<16x32xf32>
    %563 = arith.mulf %554, %505 : vector<16x32xf32>
    %564 = arith.mulf %548, %556 : vector<16x32xf32>
    %565 = arith.addf %563, %564 : vector<16x32xf32>
    %566 = math.tanh %565 : vector<16x32xf32>
    %567 = arith.mulf %562, %566 : vector<16x32xf32>
    %568 = arith.index_cast %c7_i32_157 : i32 to index
    %c0_167 = arith.constant 0 : index
    %c0_168 = arith.constant 0 : index
    %569 = vector.load %arg7[%568, %c0_167, %c0_168] : memref<8x16x1xf32, #tpu.memory_space<vmem>>, vector<1x16x1xf32>
    %570 = vector.shape_cast %569 : vector<1x16x1xf32> to vector<16x1xf32>
    %571 = vector.shape_cast %570 : vector<16x1xf32> to vector<16x1xf32>
    %572 = vector.broadcast %571 : vector<16x1xf32> to vector<16x32xf32>
    %573 = arith.subf %567, %502 : vector<16x32xf32>
    %574 = arith.mulf %572, %573 : vector<16x32xf32>
    %575 = arith.addf %502, %574 : vector<16x32xf32>
    %576 = arith.subf %565, %505 : vector<16x32xf32>
    %577 = arith.mulf %572, %576 : vector<16x32xf32>
    %578 = arith.addf %505, %577 : vector<16x32xf32>
    %579 = arith.mulf %572, %567 : vector<16x32xf32>
    %580 = arith.truncf %579 : vector<16x32xf32> to vector<16x32xbf16>
    %cst_169 = arith.constant dense<0.000000e+00> : vector<16x256xf32>
    %581 = tpu.matmul %580, %14, %cst_169 {dimension_numbers = #tpu.dot_dimension_numbers<[1], [0], [0], [1], [0, 0, 1, 1], [], []>} : vector<16x32xbf16>, vector<32x256xbf16>, vector<16x256xf32> -> vector<16x256xf32>
    %582 = arith.index_cast %c7_i32_157 : i32 to index
    %c0_170 = arith.constant 0 : index
    %c0_171 = arith.constant 0 : index
    %583 = vector.load %arg8[%582, %c0_170, %c0_171] : memref<8x8x128xf32, #tpu.memory_space<vmem>>, vector<1x8x128xf32>
    %584 = vector.shape_cast %583 : vector<1x8x128xf32> to vector<8x128xf32>
    %585 = vector.extract_strided_slice %581 {offsets = [0, 0], sizes = [8, 128], strides = [1, 1]} : vector<16x256xf32> to vector<8x128xf32>
    %586 = arith.addf %584, %585 : vector<8x128xf32>
    %587 = arith.index_cast %c7_i32_157 : i32 to index
    %c0_172 = arith.constant 0 : index
    %c0_173 = arith.constant 0 : index
    %588 = vector.load %arg8[%587, %c0_172, %c0_173] : memref<8x8x128xf32, #tpu.memory_space<vmem>>, vector<1x8x128xf32>
    %589 = vector.shape_cast %588 : vector<1x8x128xf32> to vector<8x128xf32>
    %590 = vector.shape_cast %586 : vector<8x128xf32> to vector<1x8x128xf32>
    tpu.vector_store %arg8[%587, %c0_172, %c0_173], %590 {strides = array<i32>} : memref<8x8x128xf32, #tpu.memory_space<vmem>>, vector<1x8x128xf32>,
    %591 = arith.index_cast %527 : i32 to index
    %c0_174 = arith.constant 0 : index
    %c0_175 = arith.constant 0 : index
    %592 = vector.load %arg8[%591, %c0_174, %c0_175] : memref<8x8x128xf32, #tpu.memory_space<vmem>>, vector<1x8x128xf32>
    %593 = vector.shape_cast %592 : vector<1x8x128xf32> to vector<8x128xf32>
    %594 = vector.extract_strided_slice %581 {offsets = [8, 128], sizes = [8, 128], strides = [1, 1]} : vector<16x256xf32> to vector<8x128xf32>
    %595 = arith.addf %593, %594 : vector<8x128xf32>
    %596 = arith.index_cast %527 : i32 to index
    %c0_176 = arith.constant 0 : index
    %c0_177 = arith.constant 0 : index
    %597 = vector.load %arg8[%596, %c0_176, %c0_177] : memref<8x8x128xf32, #tpu.memory_space<vmem>>, vector<1x8x128xf32>
    %598 = vector.shape_cast %597 : vector<1x8x128xf32> to vector<8x128xf32>
    %599 = vector.shape_cast %595 : vector<8x128xf32> to vector<1x8x128xf32>
    tpu.vector_store %arg8[%596, %c0_176, %c0_177], %599 {strides = array<i32>} : memref<8x8x128xf32, #tpu.memory_space<vmem>>, vector<1x8x128xf32>,
    %c8_i32 = arith.constant 8 : i32
    %c0_178 = arith.constant 0 : index
    %c0_179 = arith.constant 0 : index
    %c0_180 = arith.constant 0 : index
    %600 = vector.load %arg8[%c0_178, %c0_179, %c0_180] : memref<8x8x128xf32, #tpu.memory_space<vmem>>, vector<8x8x128xf32>
    %601 = vector.shape_cast %600 : vector<8x8x128xf32> to vector<64x128xf32>
    %cst_181 = arith.constant dense<0xFF800000> : vector<64xf32>
    %602 = vector.multi_reduction <maximumf>, %601, %cst_181 [1] : vector<64x128xf32> to vector<64xf32>
    %603 = vector.shape_cast %602 : vector<64xf32> to vector<64x1xf32>
    %604 = vector.broadcast %603 : vector<64x1xf32> to vector<64x128xf32>
    %605 = arith.subf %601, %604 : vector<64x128xf32>
    %606 = math.exp %605 : vector<64x128xf32>
    %cst_182 = arith.constant dense<0.000000e+00> : vector<64xf32>
    %607 = vector.multi_reduction <add>, %606, %cst_182 [1] : vector<64x128xf32> to vector<64xf32>
    %608 = vector.shape_cast %607 : vector<64xf32> to vector<64x1xf32>
    %609 = math.log %608 : vector<64x1xf32>
    %610 = arith.addf %603, %609 : vector<64x1xf32>
    %611 = vector.broadcast %610 : vector<64x1xf32> to vector<64x128xf32>
    %612 = arith.subf %601, %611 : vector<64x128xf32>
    %613 = vector.shape_cast %612 : vector<64x128xf32> to vector<8x8x128xf32>
    %c0_183 = arith.constant 0 : index
    %c0_184 = arith.constant 0 : index
    %c0_185 = arith.constant 0 : index
    %614 = vector.load %arg8[%c0_183, %c0_184, %c0_185] : memref<8x8x128xf32, #tpu.memory_space<vmem>>, vector<8x8x128xf32>
    tpu.vector_store %arg8[%c0_183, %c0_184, %c0_185], %613 {strides = array<i32>} : memref<8x8x128xf32, #tpu.memory_space<vmem>>, vector<8x8x128xf32>,
    return
  }
  func.func @transform_0(%arg0: i32) -> (i32, i32) {
    %c0_i32 = arith.constant 0 : i32
    %c0_i32_0 = arith.constant 0 : i32
    %c0_i32_1 = arith.constant 0 : i32
    return %c0_i32, %c0_i32_0 : i32, i32
  }
  func.func @transform_1(%arg0: i32) -> (i32, i32) {
    %c0_i32 = arith.constant 0 : i32
    %c0_i32_0 = arith.constant 0 : i32
    %c0_i32_1 = arith.constant 0 : i32
    return %c0_i32, %c0_i32_0 : i32, i32
  }
  func.func @transform_2(%arg0: i32) -> (i32, i32) {
    %c0_i32 = arith.constant 0 : i32
    %c0_i32_0 = arith.constant 0 : i32
    %c0_i32_1 = arith.constant 0 : i32
    return %c0_i32, %c0_i32_0 : i32, i32
  }
  func.func @transform_3(%arg0: i32) -> (i32, i32) {
    %c0_i32 = arith.constant 0 : i32
    %c0_i32_0 = arith.constant 0 : i32
    %c0_i32_1 = arith.constant 0 : i32
    return %c0_i32, %c0_i32_0 : i32, i32
  }
  func.func @transform_4(%arg0: i32) -> (i32, i32) {
    %c0_i32 = arith.constant 0 : i32
    %c0_i32_0 = arith.constant 0 : i32
    %c0_i32_1 = arith.constant 0 : i32
    return %c0_i32, %c0_i32_0 : i32, i32
  }
  func.func @transform_5(%arg0: i32) -> (i32, i32) {
    %c0_i32 = arith.constant 0 : i32
    %c0_i32_0 = arith.constant 0 : i32
    %c0_i32_1 = arith.constant 0 : i32
    return %c0_i32, %c0_i32_0 : i32, i32
  }
  func.func @transform_6(%arg0: i32) -> (i32, i32, i32) {
    %c0_i32 = arith.constant 0 : i32
    %c0_i32_0 = arith.constant 0 : i32
    %c0_i32_1 = arith.constant 0 : i32
    %c0_i32_2 = arith.constant 0 : i32
    return %c0_i32, %c0_i32_0, %c0_i32_1 : i32, i32, i32
  }
  func.func @transform_7(%arg0: i32) -> (i32, i32, i32) {
    %c0_i32 = arith.constant 0 : i32
    %c0_i32_0 = arith.constant 0 : i32
    %c0_i32_1 = arith.constant 0 : i32
    %c0_i32_2 = arith.constant 0 : i32
    return %c0_i32, %c0_i32_0, %c0_i32_1 : i32, i32, i32
  }
}

</mosaic_0001>

<bundles_post_ra>
// kernel: tpu_custom_call.1
= control target key start
LH: loop header
LB: loop body
LE: loop exit
PB: predicated region body
PF: predicated region fallthrough
CT: control target
= control target key end

     0   :  { %vm111_vm0 = vcmask 1043456   ;;  %v2121_v4 = vmov 0   ;;  %s2774_s0 = inlined_call_operand.vmem [shape: bf16[64,40], index: 0, kind: input, shape index: {}]   ;;  %s2775_s1 = inlined_call_operand.vmem [shape: bf16[40,256], index: 1, kind: input, shape index: {}]   ;;  %s2776_s2 = inlined_call_operand.vmem [shape: f32[1,256], index: 2, kind: input, shape index: {}]   ;;  %s2777_s3 = inlined_call_operand.vmem [shape: bf16[32,256], index: 3, kind: input, shape index: {}]   ;;  %s2778_s4 = inlined_call_operand.vmem [shape: bf16[32,256], index: 4, kind: input, shape index: {}]   ;;  %s2779_s5 = inlined_call_operand.vmem [shape: f32[1,128], index: 5, kind: input, shape index: {}]   ;;  %s2780_s6 = inlined_call_operand.vmem [shape: f32[8,16,1], index: 6, kind: input, shape index: {}]   ;;  %s2781_s7 = inlined_call_operand.hbm [shape: f32[8,8,128], index: 7, kind: output, shape index: {}]  }
   0x1   :  { %v40_v0 = vld [vmem:[%s2775_s1 + $0x20] sm:$0xff]  ;;  %v1909_v3 = vld [vmem:[%s2775_s1 + $0x14] ss:$8 sps:$4 sm:$0xff]   ;;  %150 = vmatprep.mubr.bf16.mxu0 %v2121_v4  ;;  %286 = vmatprep.mubr.bf16.mxu1 %v2121_v4  ;;  %v2183_v6 = vld [vmem:[%s2777_s3 + $0x10] ss:$8 sps:$4 sm:$0xff]  }
   0x2   :  { %v1839_v1 = vcombine.high %v40_v0, %v40_v0  ;;  %v1838_v2 = vcombine.low %v40_v0, %v40_v0  ;;  %v2178_v5 = vld [vmem:[%s2777_s3 + $0x14] ss:$8 sps:$4 sm:$0xff]   ;;  %1905 = vset.pattern.permute.xlu0 %v2121_v4  ;;  %1906 = vset.pattern.permute.xlu1 %v2121_v4  ;;  %v1911_v8 = vld [vmem:[%s2775_s1 + $0x10] ss:$8 sps:$4 sm:$0xff]   ;;  %v1915_v9 = vld [vmem:[%s2775_s1 + $0x4] ss:$8 sps:$4 sm:$0xff]  }
   0x3   :  { %266 = vmatprep.subr.bf16.mxu1 %v2178_v5  ;;  %v2198_v10 = vld [vmem:[%s2777_s3 + $0x4] ss:$8 sps:$4 sm:$0xff]   ;;  %v2203_v11 = vld [vmem:[%s2777_s3] ss:$8 sps:$4 sm:$0xff]  }
   0x4   :  { %1840 = vmatprep.subr.msk.bf16.mxu0 %vm111_vm0, %v1839_v1  ;;  %v113_v7 = vsel %vm111_vm0, %v1838_v2, 0  ;;  %267 = vmatpush1.bf16.msra.mxu1 %v2183_v6  ;;  %v1917_v12 = vld [vmem:[%s2775_s1] ss:$8 sps:$4 sm:$0xff]  }
   0x5   :  { %129 = vmatpush1.bf16.msra.mxu0 %v113_v7  ;;  %268 = vmatprep.subr.bf16.mxu1 %v2198_v10  ;;  %v1921_v13 = vld [vmem:[%s2774_s0] sm:$0xff]  }
   0x6   :  { %130 = vmatprep.subr.bf16.mxu0 %v1909_v3 }
   0x8   :  { %269 = vmatpush1.bf16.msra.mxu1 %v2203_v11 }
   0x9   :  { %131 = vmatpush1.bf16.msra.mxu0 %v1911_v8 }
   0xa   :  { %132 = vmatprep.subr.bf16.mxu0 %v1915_v9 }
   0xb   :  { %12 = vsyncpa [#allocation4], 0  ;;  %vm98_vm1 = vcmask 326656   ;;  %287 = vmatmul.mubr.bf16.vlgmr.msra.gmra.mxu1 %v2121_v4  ;;  %v1922_v14 = vld [vmem:[%s2774_s0 + $0x8] sm:$0xff]   ;;  %v1923_v15 = vld [vmem:[%s2774_s0 + $0x10] sm:$0xff]   ;;  %v43_v17 = vlaneseq  ;;  %s2123_s29 = smov 32  }
   0xc   :  { %427 = vmatprep.mubr.bf16.mxu1 %v2121_v4  ;;  %v1924_v16 = vld [vmem:[%s2774_s0 + $0x18] sm:$0xff]   ;;  %v41_v20 = vld [vmem:[%s2776_s2] sm:$0x3]  ;;  %s2122_s0 = smov 64   ;;  %vm250_vm2 = vcmask 261120  }
   0xd   :  { %133 = vmatpush1.bf16.msra.mxu0 %v1917_v12  ;;  %v44_v18 = vshrl.u32 %v43_v17, 7  ;;  %v348_v0 = vld [vmem:[%s2780_s6] sm:$0xff] }
   0xf   :  { %v45_v19 = vsub.s32 0, %v44_v18  ;;  %v49_v21 = vsub.s32 1, %v44_v18  ;;  %v349_v18 = vld [vmem:[%s2780_s6 + $0x8] sm:$0xff] }
  0x10   :  { %1841 = vmatmul.mubr.msk.bf16.vlgmr.msra.gmra.mxu0 %vm98_vm1, %v1921_v13 }
  0x11   :  { %160 = vmatprep.mubr.bf16.mxu0 %v2121_v4  ;;  %v46_v22 = vrot.slane %v41_v20, %v45_v19  ;;  %v50_v24 = vrot.slane %v41_v20, %v49_v21 }
  0x18   :  { %1842 = vmatmul.mubr.msk.bf16.gmra.mxu0 %vm98_vm1, %v1922_v14 }
  0x19   :  { %170 = vmatprep.mubr.bf16.mxu0 %v2121_v4 }
  0x20   :  { %1843 = vmatmul.mubr.msk.bf16.gmra.mxu0 %vm98_vm1, %v1923_v15 }
  0x21   :  { %180 = vmatprep.mubr.bf16.mxu0 %v2121_v4 }
  0x28   :  { %1844 = vmatmul.mubr.msk.bf16.gmra.mxu0 %vm98_vm1, %v1924_v16 }
  0x29   :  { %796 = vmatprep.mubr.bf16.mxu0 %v2121_v4 }
  0xcb   :  { %v288_v23 = vpop.f32.mrf.mxu1 }
  0xcd   :  { %v290_v25 = vpop.f32.mrf.mxu1 }
  0xcf   :  { %v291_v28 = vpop.f32.mrf.mxu1 }
  0xd0   :  { %v152_v26 = vpop.f32.mrf.mxu0  ;;  %v1928_v28 = vld [vmem:[%s2778_s4 + $0x4] ss:$8 sps:$4 sm:$0xff]  }
  0xd1   :  { %v153_v27 = vadd.f32 %v152_v26, %v46_v22  ;;  %v292_v61 = vpop.f32.mrf.mxu1  ;;  %v1925_v26 = vld [vmem:[%s2778_s4 + $0x14] ss:$8 sps:$4 sm:$0xff]  }
  0xd2   :  { %v154_v29 = vpop.f32.mrf.mxu0  ;;  %407 = vmatprep.subr.bf16.mxu1 %v1925_v26  ;;  %776 = vmatprep.subr.bf16.mxu0 %v1925_v26 }
  0xd3   :  { %v2231_v30 = vadd.f32 %v154_v29, %v50_v24  ;;  %v298_v31 = vadd.f32 %v288_v23, %v153_v27  ;;  %v1927_v27 = vld [vmem:[%s2778_s4 + $0x10] ss:$8 sps:$4 sm:$0xff]   ;;  %v1930_v29 = vld [vmem:[%s2778_s4] ss:$8 sps:$4 sm:$0xff]  }
  0xd4   :  { %v156_v32 = vpop.f32.mrf.mxu0  ;;  %408 = vmatpush1.bf16.msra.mxu1 %v1927_v27  ;;  %777 = vmatpush1.bf16.msra.mxu0 %v1927_v27 }
  0xd5   :  { %1931 = vtanh.f32 %v298_v31  ;;  %v2233_v33 = vadd.f32 %v156_v32, %v46_v22  ;;  %v1850_v1 = vmul.f32 -1.442695, %v298_v31  ;;  %409 = vmatprep.subr.bf16.mxu1 %v1928_v28  ;;  %778 = vmatprep.subr.bf16.mxu0 %v1928_v28 }
  0xd6   :  { %v158_v34 = vpop.f32.mrf.mxu0 }
  0xd7   :  { %v2235_v35 = vadd.f32 %v158_v34, %v50_v24 }
  0xd8   :  { %v162_v36 = vpop.f32.mrf.mxu0  ;;  %410 = vmatpush1.bf16.msra.mxu1 %v1930_v29  ;;  %779 = vmatpush1.bf16.msra.mxu0 %v1930_v29 }
  0xd9   :  { %v2237_v37 = vadd.f32 %v162_v36, %v46_v22  ;;  %462 = vmatprep.subr.bf16.mxu1 %v2178_v5  ;;  %961 = vmatprep.subr.bf16.mxu0 %v1925_v26 }
  0xda   :  { %v164_v38 = vpop.f32.mrf.mxu0 }
  0xdb   :  { %v2239_v39 = vadd.f32 %v164_v38, %v50_v24 }
  0xdc   :  { %v166_v40 = vpop.f32.mrf.mxu0 }
  0xdd   :  { %v2241_v41 = vadd.f32 %v166_v40, %v46_v22 }
  0xde   :  { %v168_v42 = vpop.f32.mrf.mxu0 }
  0xdf   :  { %v2243_v43 = vadd.f32 %v168_v42, %v50_v24 }
  0xe0   :  { %v172_v44 = vpop.f32.mrf.mxu0 }
  0xe1   :  { %v2245_v45 = vadd.f32 %v172_v44, %v46_v22  ;;  %v1845_v44 = vld [vmem:[%s2779_s5] ss:$0 sm:$0xff] }
  0xe2   :  { %v1932_v46 = vpop.eup %1931  ;;  %v174_v47 = vpop.f32.mrf.mxu0  ;;  %216 = vst [vmem:[#allocation3 + $0x10] sm:$0xff] %v1845_v44  ;;  %217 = vst [vmem:[#allocation3 + $0x18] sm:$0xff] %v1845_v44 }
  0xe3   :  { %v2247_v48 = vadd.f32 %v174_v47, %v50_v24  ;;  %318 = vrot.lane.b32.xlu0 %v1932_v46, %s2122_s0  ;;  %218 = vst [vmem:[#allocation3 + $0x20] sm:$0xff] %v1845_v44  ;;  %219 = vst [vmem:[#allocation3 + $0x28] sm:$0xff] %v1845_v44 }
  0xe4   :  { %v176_v49 = vpop.f32.mrf.mxu0 }
  0xe5   :  { %v2250_v50 = vadd.f32 %v176_v49, %v46_v22 }
  0xe6   :  { %v178_v51 = vpop.f32.mrf.mxu0 }
  0xe7   :  { %v2252_v52 = vadd.f32 %v178_v51, %v50_v24 }
  0xe8   :  { %v182_v53 = vpop.f32.mrf.mxu0 }
  0xe9   :  { %v2254_v54 = vadd.f32 %v182_v53, %v46_v22 }
  0xea   :  { %v184_v55 = vpop.f32.mrf.mxu0 }
  0xeb   :  { %v2256_v56 = vadd.f32 %v184_v55, %v50_v24 }
  0xec   :  { %v186_v57 = vpop.f32.mrf.mxu0 }
  0xed   :  { %v2258_v58 = vadd.f32 %v186_v57, %v46_v22 }
  0xee   :  { %v188_v59 = vpop.f32.mrf.mxu0 }
  0xef   :  { %v189_v60 = vadd.f32 %v188_v59, %v50_v24 }
  0xf1   :  { %v299_v62 = vadd.f32 %v292_v61, %v189_v60 }
  0xf3   :  { %1933 = vtanh.f32 %v299_v62  ;;  %v1851_v7 = vmul.f32 -1.442695, %v299_v62 }
  0xf4   :  { %1935 = vpow2.f32 %v1850_v1 }
 0x100   :  { %v1934_v63 = vpop.eup %1933 }
 0x101   :  { %320 = vrot.lane.b32.xlu0 %v1934_v63, %s2122_s0  ;;  %v1936_v2 = vpop.eup %1935 }
 0x102   :  { %v306_v3 = vadd.f32 1.0, %v1936_v2 }
 0x104   :  { %1937 = vrcp.f32 %v306_v3 }
 0x105   :  { %352 = vperm.xlu0 %1905, %v348_v0   ;;  %1939 = vpow2.f32 %v1851_v7 }
 0x111   :  { %v1938_v8 = vpop.eup %1937 }
 0x112   :  { %v1940_v13 = vpop.eup %1939  ;;  %v314_v19 = vmul.f32 0.0, %v1938_v8 }
 0x113   :  { %v307_v14 = vadd.f32 1.0, %v1940_v13 }
 0x115   :  { %1941 = vrcp.f32 %v307_v14 }
 0x122   :  { %v1942_v15 = vpop.eup %1941 }
 0x123   :  { %v315_v23 = vmul.f32 0.0, %v1942_v15 }
 0x155   :  { %v319_v9 = vpop.permute.xlu0 %318 }
 0x156   :  { %v324_v12 = vmul.f32 %v1938_v8, %v319_v9 }
 0x158   :  { %328 = vrot.lane.b32.xlu1 %v324_v12, %s2123_s29 }
 0x173   :  { %v321_v16 = vpop.permute.xlu0 %320 }
 0x174   :  { %v325_v17 = vmul.f32 %v1942_v15, %v321_v16 }
 0x176   :  { %330 = vrot.lane.b32.xlu1 %v325_v17, %s2123_s29 }
 0x17a   :  { %357 = vperm.xlu1 %1906, %v349_v18  }
 0x180   :  { %v2292_v34 = vpop.permute.xlu0 %352 }
 0x1ca   :  { %v329_v20 = vpop.permute.xlu1 %328 }
 0x1cb   :  { %v2269_v21 = vadd.f32 %v329_v20, %v314_v19  ;;  %v1860_v19 = vld [vmem:[%s2780_s6 + $0x10] sm:$0xff] }
 0x1cd   :  { %1943 = vtanh.f32 %v2269_v21 }
 0x1da   :  { %v1944_v22 = vpop.eup %1943 }
 0x1db   :  { %340 = vrot.lane.b32.xlu1 %v1944_v22, %s2122_s0 }
 0x1e8   :  { %v331_v24 = vpop.permute.xlu1 %330 }
 0x1e9   :  { %v2273_v25 = vadd.f32 %v331_v24, %v315_v23  ;;  %v1861_v24 = vld [vmem:[%s2780_s6 + $0x18] sm:$0xff] }
 0x1eb   :  { %1945 = vtanh.f32 %v2273_v25 }
 0x1f5   :  { %v2290_v32 = vpop.permute.xlu1 %357 }
 0x1f8   :  { %v1946_v31 = vpop.eup %1945 }
 0x1f9   :  { %342 = vrot.lane.b32.xlu0 %v1946_v31, %s2122_s0  ;;  %v2336_v31 = vmul.f32 %v2290_v32, %v2273_v25 }
 0x24d   :  { %v341_v36 = vpop.permute.xlu1 %340 }
 0x24e   :  { %v346_v38 = vmul.f32 %v1938_v8, %v341_v36 }
 0x250   :  { %v2298_v46 = vmul.f32 %v2292_v34, %v346_v38 }
 0x26b   :  { %v343_v40 = vpop.permute.xlu0 %342 }
 0x26c   :  { %v347_v42 = vmul.f32 %v1942_v15, %v343_v40 }
 0x26e   :  { %v2301_v47 = vmul.f32 %v2290_v32, %v347_v42 }
 0x270   :  { %v368_v49 = vpack.c.bf16 %v2301_v47, %v2298_v46 }
 0x272   :  { %445 = vrot.lane.b32.xlu0 %v368_v49, %s2123_s29  ;;  %370 = vrot.lane.b32.xlu1 %v368_v49, %s2123_s29 }
 0x2e4   :  { %v371_v51 = vpop.permute.xlu1 %370  ;;  %v446_v53 = vpop.permute.xlu0 %445 }
 0x2e5   :  { %1856 = vmatmul.mubr.msk.bf16.vlgmr.msra.gmra.mxu1 %vm250_vm2, %v371_v51 }
 0x2e6   :  { %463 = vmatpush1.bf16.msra.mxu1 %v2183_v6  ;;  %482 = vmatprep.mubr.bf16.mxu1 %v2121_v4 }
 0x2e7   :  { %464 = vmatprep.subr.bf16.mxu1 %v2198_v10 }
 0x2ea   :  { %465 = vmatpush1.bf16.msra.mxu1 %v2203_v11 }
 0x2eb   :  { %591 = vmatprep.subr.bf16.mxu1 %v1925_v26  ;;  %v2329_v26 = vmul.f32 %v2292_v34, %v2269_v21 }
 0x2ed   :  { %1857 = vmatmul.mubr.msk.bf16.vlgmr.msra.gmra.mxu1 %vm250_vm2, %v446_v53 }
 0x2ee   :  { %592 = vmatpush1.bf16.msra.mxu1 %v1927_v27  ;;  %611 = vmatprep.mubr.bf16.mxu1 %v2121_v4 }
 0x2ef   :  { %593 = vmatprep.subr.bf16.mxu1 %v1928_v28 }
 0x2f2   :  { %594 = vmatpush1.bf16.msra.mxu1 %v1930_v29 }
 0x2f3   :  { %647 = vmatprep.subr.bf16.mxu1 %v2178_v5 }
 0x3a5   :  { %v429_v55 = vpop.f32.mrf.mxu1 }
 0x3a6   :  { %v437_v57 = vadd.f32 %v1845_v44, %v429_v55 }
 0x3a7   :  { %v431_v59 = vpop.f32.mrf.mxu1 }
 0x3a8   :  { %438 = vst [vmem:[#allocation3] sm:$0xff] %v437_v57 }
 0x3a9   :  { %v432_v60 = vpop.f32.mrf.mxu1 }
 0x3ab   :  { %v433_v61 = vpop.f32.mrf.mxu1 }
 0x3ac   :  { %v441_v62 = vadd.f32 %v1845_v44, %v433_v61 }
 0x3ad   :  { %v484_v63 = vpop.f32.mrf.mxu1 }
 0x3ae   :  { %442 = vst [vmem:[#allocation3 + $0x38] sm:$0xff] %v441_v62  ;;  %v495_v0 = vadd.f32 %v484_v63, %v2233_v33 }
 0x3af   :  { %v486_v1 = vpop.f32.mrf.mxu1 }
 0x3b0   :  { %1947 = vtanh.f32 %v495_v0  ;;  %v1858_v12 = vmul.f32 -1.442695, %v495_v0 }
 0x3b1   :  { %v487_v2 = vpop.f32.mrf.mxu1 }
 0x3b3   :  { %v488_v3 = vpop.f32.mrf.mxu1 }
 0x3b4   :  { %v496_v7 = vadd.f32 %v488_v3, %v2256_v56 }
 0x3b6   :  { %1949 = vtanh.f32 %v496_v7  ;;  %v1859_v13 = vmul.f32 -1.442695, %v496_v7 }
 0x3b7   :  { %1951 = vpow2.f32 %v1858_v12 }
 0x3b8   :  { %1953 = vpow2.f32 %v1859_v13 }
 0x3bd   :  { %v1948_v8 = vpop.eup %1947 }
 0x3be   :  { %515 = vrot.lane.b32.xlu1 %v1948_v8, %s2122_s0 }
 0x3c3   :  { %v1950_v9 = vpop.eup %1949 }
 0x3c4   :  { %517 = vrot.lane.b32.xlu0 %v1950_v9, %s2122_s0  ;;  %v1952_v14 = vpop.eup %1951 }
 0x3c5   :  { %v503_v15 = vadd.f32 1.0, %v1952_v14  ;;  %v1954_v33 = vpop.eup %1953 }
 0x3c6   :  { %v504_v16 = vadd.f32 1.0, %v1954_v33 }
 0x3c7   :  { %1955 = vrcp.f32 %v503_v15 }
 0x3c8   :  { %1957 = vrcp.f32 %v504_v16 }
 0x3d4   :  { %v1956_v17 = vpop.eup %1955 }
 0x3d5   :  { %v1958_v20 = vpop.eup %1957  ;;  %v511_v27 = vmul.f32 %v1956_v17, %v2329_v26 }
 0x3d6   :  { %v512_v36 = vmul.f32 %v1958_v20, %v2336_v31 }
 0x430   :  { %v516_v18 = vpop.permute.xlu1 %515 }
 0x431   :  { %v521_v56 = vmul.f32 %v1956_v17, %v516_v18 }
 0x433   :  { %525 = vrot.lane.b32.xlu1 %v521_v56, %s2123_s29 }
 0x436   :  { %v518_v22 = vpop.permute.xlu0 %517 }
 0x437   :  { %v522_v23 = vmul.f32 %v1958_v20, %v518_v22  ;;  %550 = vperm.xlu1 %1906, %v1860_v19  }
 0x439   :  { %527 = vrot.lane.b32.xlu0 %v522_v23, %s2123_s29 }
 0x43d   :  { %555 = vperm.xlu0 %1905, %v1861_v24  }
 0x4a5   :  { %v526_v28 = vpop.permute.xlu1 %525 }
 0x4a6   :  { %v2332_v29 = vadd.f32 %v526_v28, %v511_v27  ;;  %v1866_v27 = vld [vmem:[%s2780_s6 + $0x20] sm:$0xff] }
 0x4a8   :  { %1959 = vtanh.f32 %v2332_v29 }
 0x4ab   :  { %v528_v38 = vpop.permute.xlu0 %527 }
 0x4ac   :  { %v2340_v40 = vadd.f32 %v528_v38, %v512_v36 }
 0x4ae   :  { %1961 = vtanh.f32 %v2340_v40 }
 0x4b2   :  { %v2345_v42 = vpop.permute.xlu1 %550 }
 0x4b5   :  { %v1960_v21 = vpop.eup %1959 }
 0x4b6   :  { %537 = vrot.lane.b32.xlu1 %v1960_v21, %s2122_s0  ;;  %v1867_v21 = vld [vmem:[%s2780_s6 + $0x28] sm:$0xff] }
 0x4b8   :  { %v2347_v32 = vpop.permute.xlu0 %555 }
 0x4bb   :  { %v1962_v34 = vpop.eup %1961 }
 0x4bc   :  { %539 = vrot.lane.b32.xlu0 %v1962_v34, %s2122_s0  ;;  %v564_v34 = vsub.f32 %v2332_v29, %v2329_v26 }
 0x528   :  { %v538_v44 = vpop.permute.xlu1 %537 }
 0x529   :  { %v543_v25 = vmul.f32 %v1956_v17, %v538_v44  ;;  %v566_v44 = vmul.f32 %v564_v34, %v2345_v42 }
 0x52b   :  { %v558_v49 = vsub.f32 %v543_v25, %v2298_v46  ;;  %v570_v57 = vmul.f32 %v2345_v42, %v543_v25  ;;  %v565_v25 = vsub.f32 %v2340_v40, %v2336_v31 }
 0x52d   :  { %v560_v55 = vmul.f32 %v558_v49, %v2345_v42  ;;  %v2399_v49 = vadd.f32 %v566_v44, %v2329_v26 }
 0x52e   :  { %v540_v51 = vpop.permute.xlu0 %539 }
 0x52f   :  { %v544_v53 = vmul.f32 %v1958_v20, %v540_v51  ;;  %v2356_v63 = vadd.f32 %v560_v55, %v2298_v46  ;;  %v567_v51 = vmul.f32 %v565_v25, %v2347_v32 }
 0x531   :  { %v559_v59 = vsub.f32 %v544_v53, %v2301_v47  ;;  %v571_v60 = vmul.f32 %v2347_v32, %v544_v53 }
 0x533   :  { %v561_v61 = vmul.f32 %v559_v59, %v2347_v32  ;;  %v572_v62 = vpack.c.bf16 %v571_v60, %v570_v57  ;;  %v2406_v59 = vadd.f32 %v567_v51, %v2336_v31  ;;  %v1873_v51 = vld [vmem:[%s2780_s6 + $0x38] sm:$0xff] }
 0x535   :  { %v2359_v0 = vadd.f32 %v561_v61, %v2301_v47  ;;  %574 = vrot.lane.b32.xlu1 %v572_v62, %s2123_s29 }
 0x537   :  { %v628_v1 = vpack.c.bf16 %v2359_v0, %v2356_v63 }
 0x539   :  { %630 = vrot.lane.b32.xlu0 %v628_v1, %s2123_s29 }
 0x5a7   :  { %v575_v2 = vpop.permute.xlu1 %574 }
 0x5a8   :  { %1862 = vmatmul.mubr.msk.bf16.vlgmr.msra.gmra.mxu1 %vm250_vm2, %v575_v2 }
 0x5a9   :  { %648 = vmatpush1.bf16.msra.mxu1 %v2183_v6  ;;  %667 = vmatprep.mubr.bf16.mxu1 %v2121_v4 }
 0x5aa   :  { %649 = vmatprep.subr.bf16.mxu1 %v2198_v10 }
 0x5ab   :  { %v631_v46 = vpop.permute.xlu0 %630 }
 0x5ad   :  { %650 = vmatpush1.bf16.msra.mxu1 %v2203_v11 }
 0x5ae   :  { %832 = vmatprep.subr.bf16.mxu1 %v2178_v5 }
 0x5b0   :  { %1863 = vmatmul.mubr.msk.bf16.vlgmr.msra.gmra.mxu1 %vm250_vm2, %v631_v46 }
 0x5b1   :  { %833 = vmatpush1.bf16.msra.mxu1 %v2183_v6  ;;  %852 = vmatprep.mubr.bf16.mxu1 %v2121_v4 }
 0x5b2   :  { %834 = vmatprep.subr.bf16.mxu1 %v2198_v10 }
 0x5b5   :  { %835 = vmatpush1.bf16.msra.mxu1 %v2203_v11 }
 0x5b6   :  { %1017 = vmatprep.subr.bf16.mxu1 %v2178_v5 }
 0x668   :  { %v2377_v47 = vpop.f32.mrf.mxu1 }
 0x66a   :  { %v615_v3 = vpop.f32.mrf.mxu1 }
 0x66c   :  { %v616_v7 = vpop.f32.mrf.mxu1 }
 0x66e   :  { %v2379_v8 = vpop.f32.mrf.mxu1 }
 0x670   :  { %v669_v9 = vpop.f32.mrf.mxu1 }
 0x671   :  { %v680_v12 = vadd.f32 %v669_v9, %v2237_v37 }
 0x672   :  { %v671_v13 = vpop.f32.mrf.mxu1 }
 0x673   :  { %1963 = vtanh.f32 %v680_v12  ;;  %v1864_v18 = vmul.f32 -1.442695, %v680_v12 }
 0x674   :  { %v672_v14 = vpop.f32.mrf.mxu1 }
 0x676   :  { %v673_v15 = vpop.f32.mrf.mxu1 }
 0x677   :  { %v681_v33 = vadd.f32 %v673_v15, %v2252_v52 }
 0x679   :  { %1965 = vtanh.f32 %v681_v33  ;;  %v1865_v56 = vmul.f32 -1.442695, %v681_v33 }
 0x67a   :  { %1967 = vpow2.f32 %v1864_v18 }
 0x67b   :  { %1969 = vpow2.f32 %v1865_v56 }
 0x680   :  { %v1964_v16 = vpop.eup %1963 }
 0x681   :  { %700 = vrot.lane.b32.xlu1 %v1964_v16, %s2122_s0 }
 0x686   :  { %v1966_v17 = vpop.eup %1965 }
 0x687   :  { %702 = vrot.lane.b32.xlu0 %v1966_v17, %s2122_s0  ;;  %v1968_v19 = vpop.eup %1967 }
 0x688   :  { %v688_v20 = vadd.f32 1.0, %v1968_v19  ;;  %v1970_v37 = vpop.eup %1969 }
 0x689   :  { %v689_v22 = vadd.f32 1.0, %v1970_v37 }
 0x68a   :  { %1971 = vrcp.f32 %v688_v20 }
 0x68b   :  { %1973 = vrcp.f32 %v689_v22 }
 0x697   :  { %v1972_v23 = vpop.eup %1971 }
 0x698   :  { %v1974_v28 = vpop.eup %1973  ;;  %v696_v53 = vmul.f32 %v1972_v23, %v2399_v49 }
 0x699   :  { %v697_v29 = vmul.f32 %v1974_v28, %v2406_v59 }
 0x6f3   :  { %v701_v24 = vpop.permute.xlu1 %700 }
 0x6f4   :  { %v706_v52 = vmul.f32 %v1972_v23, %v701_v24 }
 0x6f6   :  { %710 = vrot.lane.b32.xlu1 %v706_v52, %s2123_s29 }
 0x6f9   :  { %v703_v36 = vpop.permute.xlu0 %702 }
 0x6fa   :  { %v707_v38 = vmul.f32 %v1974_v28, %v703_v36  ;;  %735 = vperm.xlu1 %1906, %v1866_v27  }
 0x6fc   :  { %712 = vrot.lane.b32.xlu0 %v707_v38, %s2123_s29 }
 0x700   :  { %740 = vperm.xlu0 %1905, %v1867_v21   ;;  %v1872_v21 = vld [vmem:[%s2780_s6 + $0x30] sm:$0xff] }
 0x768   :  { %v711_v55 = vpop.permute.xlu1 %710 }
 0x769   :  { %v2403_v57 = vadd.f32 %v711_v55, %v696_v53 }
 0x76b   :  { %1975 = vtanh.f32 %v2403_v57  ;;  %v749_v53 = vsub.f32 %v2403_v57, %v2399_v49 }
 0x76e   :  { %v713_v42 = vpop.permute.xlu0 %712 }
 0x76f   :  { %v2410_v60 = vadd.f32 %v713_v42, %v697_v29 }
 0x771   :  { %1977 = vtanh.f32 %v2410_v60  ;;  %v750_v29 = vsub.f32 %v2410_v60, %v2406_v59 }
 0x775   :  { %v736_v32 = vpop.permute.xlu1 %735 }
 0x776   :  { %v751_v55 = vmul.f32 %v749_v53, %v736_v32  ;;  %v1878_v53 = vld [vmem:[%s2780_s6 + $0x40] sm:$0xff] }
 0x778   :  { %v1976_v26 = vpop.eup %1975  ;;  %v2455_v42 = vadd.f32 %v751_v55, %v2399_v49 }
 0x779   :  { %722 = vrot.lane.b32.xlu1 %v1976_v26, %s2122_s0 }
 0x77b   :  { %v741_v31 = vpop.permute.xlu0 %740 }
 0x77c   :  { %v752_v26 = vmul.f32 %v750_v29, %v741_v31 }
 0x77e   :  { %v1978_v40 = vpop.eup %1977 }
 0x77f   :  { %724 = vrot.lane.b32.xlu0 %v1978_v40, %s2122_s0 }
 0x7eb   :  { %v723_v61 = vpop.permute.xlu1 %722 }
 0x7ec   :  { %v728_v62 = vmul.f32 %v1972_v23, %v723_v61 }
 0x7ee   :  { %v743_v1 = vsub.f32 %v728_v62, %v2356_v63  ;;  %v2416_v7 = vmul.f32 %v736_v32, %v728_v62 }
 0x7f0   :  { %v745_v3 = vmul.f32 %v743_v1, %v736_v32  ;;  %v2461_v1 = vadd.f32 %v752_v26, %v2406_v59 }
 0x7f1   :  { %v725_v2 = vpop.permute.xlu0 %724 }
 0x7f2   :  { %v729_v46 = vmul.f32 %v1974_v28, %v725_v2  ;;  %v2424_v15 = vadd.f32 %v745_v3, %v2356_v63 }
 0x7f4   :  { %v744_v9 = vsub.f32 %v729_v46, %v2359_v0  ;;  %v2419_v12 = vmul.f32 %v741_v31, %v729_v46 }
 0x7f6   :  { %v746_v13 = vmul.f32 %v744_v9, %v741_v31  ;;  %v757_v14 = vpack.c.bf16 %v2419_v12, %v2416_v7 }
 0x7f8   :  { %v2427_v33 = vadd.f32 %v746_v13, %v2359_v0 }
 0x7fa   :  { %v813_v16 = vpack.c.bf16 %v2427_v33, %v2424_v15 }
 0x7fc   :  { %815 = vrot.lane.b32.xlu1 %v813_v16, %s2123_s29 }
 0x86e   :  { %v816_v17 = vpop.permute.xlu1 %815 }
 0x86f   :  { %1869 = vmatmul.mubr.msk.bf16.vlgmr.msra.gmra.mxu1 %vm250_vm2, %v816_v17 }
 0x870   :  { %1018 = vmatpush1.bf16.msra.mxu1 %v2183_v6  ;;  %1037 = vmatprep.mubr.bf16.mxu1 %v2121_v4 }
 0x871   :  { %1019 = vmatprep.subr.bf16.mxu1 %v2198_v10 }
 0x874   :  { %1020 = vmatpush1.bf16.msra.mxu1 %v2203_v11 }
 0x875   :  { %1198 = vmatprep.subr.bf16.mxu1 %v2178_v5 }
 0x92f   :  { %v854_v63 = vpop.f32.mrf.mxu1 }
 0x930   :  { %v865_v0 = vadd.f32 %v854_v63, %v2241_v41 }
 0x931   :  { %v856_v18 = vpop.f32.mrf.mxu1 }
 0x932   :  { %1979 = vtanh.f32 %v865_v0  ;;  %v1870_v23 = vmul.f32 -1.442695, %v865_v0 }
 0x933   :  { %v857_v56 = vpop.f32.mrf.mxu1 }
 0x935   :  { %v858_v19 = vpop.f32.mrf.mxu1 }
 0x936   :  { %v866_v20 = vadd.f32 %v858_v19, %v2247_v48 }
 0x938   :  { %1981 = vtanh.f32 %v866_v20  ;;  %v1871_v24 = vmul.f32 -1.442695, %v866_v20 }
 0x939   :  { %1983 = vpow2.f32 %v1870_v23 }
 0x93a   :  { %1985 = vpow2.f32 %v1871_v24 }
 0x93f   :  { %v1980_v37 = vpop.eup %1979 }
 0x940   :  { %885 = vrot.lane.b32.xlu0 %v1980_v37, %s2122_s0 }
 0x945   :  { %v1982_v22 = vpop.eup %1981 }
 0x946   :  { %887 = vrot.lane.b32.xlu1 %v1982_v22, %s2122_s0  ;;  %v1984_v52 = vpop.eup %1983 }
 0x947   :  { %v873_v27 = vadd.f32 1.0, %v1984_v52  ;;  %v1986_v41 = vpop.eup %1985 }
 0x948   :  { %v874_v28 = vadd.f32 1.0, %v1986_v41 }
 0x949   :  { %1987 = vrcp.f32 %v873_v27 }
 0x94a   :  { %1989 = vrcp.f32 %v874_v28 }
 0x956   :  { %v1988_v36 = vpop.eup %1987 }
 0x957   :  { %v1990_v34 = vpop.eup %1989  ;;  %v881_v40 = vmul.f32 %v1988_v36, %v2455_v42 }
 0x958   :  { %v882_v57 = vmul.f32 %v1990_v34, %v2461_v1 }
 0x9b2   :  { %v886_v38 = vpop.permute.xlu0 %885 }
 0x9b3   :  { %v891_v48 = vmul.f32 %v1988_v36, %v886_v38 }
 0x9b5   :  { %895 = vrot.lane.b32.xlu0 %v891_v48, %s2123_s29 }
 0x9b8   :  { %v888_v44 = vpop.permute.xlu1 %887 }
 0x9b9   :  { %v892_v25 = vmul.f32 %v1990_v34, %v888_v44  ;;  %920 = vperm.xlu0 %1905, %v1872_v21  }
 0x9bb   :  { %897 = vrot.lane.b32.xlu1 %v892_v25, %s2123_s29 }
 0x9bf   :  { %925 = vperm.xlu1 %1906, %v1873_v51  }
 0xa27   :  { %v896_v61 = vpop.permute.xlu0 %895 }
 0xa28   :  { %v2458_v62 = vadd.f32 %v896_v61, %v881_v40  ;;  %v1879_v40 = vld [vmem:[%s2780_s6 + $0x48] sm:$0xff] }
 0xa2a   :  { %1991 = vtanh.f32 %v2458_v62  ;;  %v934_v61 = vsub.f32 %v2458_v62, %v2455_v42 }
 0xa2d   :  { %v898_v32 = vpop.permute.xlu1 %897 }
 0xa2e   :  { %v2465_v2 = vadd.f32 %v898_v32, %v882_v57 }
 0xa30   :  { %1993 = vtanh.f32 %v2465_v2  ;;  %v935_v32 = vsub.f32 %v2465_v2, %v2461_v1 }
 0xa34   :  { %v921_v31 = vpop.permute.xlu0 %920 }
 0xa35   :  { %v936_v57 = vmul.f32 %v934_v61, %v921_v31 }
 0xa37   :  { %v1992_v49 = vpop.eup %1991 }
 0xa38   :  { %907 = vrot.lane.b32.xlu0 %v1992_v49, %s2122_s0  ;;  %v2510_v49 = vadd.f32 %v936_v57, %v2455_v42  ;;  %v1885_v57 = vld [vmem:[%s2780_s6 + $0x58] sm:$0xff] }
 0xa3a   :  { %v926_v59 = vpop.permute.xlu1 %925 }
 0xa3d   :  { %v1994_v60 = vpop.eup %1993 }
 0xa3e   :  { %909 = vrot.lane.b32.xlu1 %v1994_v60, %s2122_s0  ;;  %v937_v60 = vmul.f32 %v935_v32, %v926_v59 }
 0xaaa   :  { %v908_v46 = vpop.permute.xlu0 %907 }
 0xaab   :  { %v913_v3 = vmul.f32 %v1988_v36, %v908_v46 }
 0xaad   :  { %v928_v9 = vsub.f32 %v913_v3, %v2424_v15  ;;  %v2471_v63 = vmul.f32 %v921_v31, %v913_v3 }
 0xaaf   :  { %v930_v17 = vmul.f32 %v928_v9, %v921_v31 }
 0xab0   :  { %v910_v13 = vpop.permute.xlu1 %909 }
 0xab1   :  { %v914_v16 = vmul.f32 %v1990_v34, %v910_v13  ;;  %v2479_v20 = vadd.f32 %v930_v17, %v2424_v15  ;;  %v2516_v13 = vadd.f32 %v937_v60, %v2461_v1 }
 0xab3   :  { %v929_v0 = vsub.f32 %v914_v16, %v2427_v33  ;;  %v2474_v18 = vmul.f32 %v926_v59, %v914_v16 }
 0xab5   :  { %v931_v56 = vmul.f32 %v929_v0, %v926_v59  ;;  %v942_v19 = vpack.c.bf16 %v2474_v18, %v2471_v63 }
 0xab7   :  { %v2482_v37 = vadd.f32 %v931_v56, %v2427_v33 }
 0xab9   :  { %v998_v22 = vpack.c.bf16 %v2482_v37, %v2479_v20 }
 0xabb   :  { %1000 = vrot.lane.b32.xlu0 %v998_v22, %s2123_s29 }
 0xb2d   :  { %v1001_v23 = vpop.permute.xlu0 %1000 }
 0xb2e   :  { %1875 = vmatmul.mubr.msk.bf16.vlgmr.msra.gmra.mxu1 %vm250_vm2, %v1001_v23 }
 0xb2f   :  { %1199 = vmatpush1.bf16.msra.mxu1 %v2183_v6  ;;  %1218 = vmatprep.mubr.bf16.mxu1 %v2121_v4 }
 0xb30   :  { %1200 = vmatprep.subr.bf16.mxu1 %v2198_v10 }
 0xb33   :  { %1201 = vmatpush1.bf16.msra.mxu1 %v2203_v11 }
 0xb34   :  { %1379 = vmatprep.subr.bf16.mxu1 %v2178_v5 }
 0xbee   :  { %v1039_v15 = vpop.f32.mrf.mxu1 }
 0xbef   :  { %v1048_v33 = vadd.f32 %v1039_v15, %v2245_v45 }
 0xbf0   :  { %v1041_v24 = vpop.f32.mrf.mxu1 }
 0xbf1   :  { %1995 = vtanh.f32 %v1048_v33  ;;  %v1876_v38 = vmul.f32 -1.442695, %v1048_v33 }
 0xbf2   :  { %v1042_v52 = vpop.f32.mrf.mxu1 }
 0xbf4   :  { %v1043_v27 = vpop.f32.mrf.mxu1 }
 0xbf5   :  { %v1049_v41 = vadd.f32 %v1043_v27, %v2243_v43 }
 0xbf7   :  { %1997 = vtanh.f32 %v1049_v41  ;;  %v1877_v48 = vmul.f32 -1.442695, %v1049_v41 }
 0xbf8   :  { %1999 = vpow2.f32 %v1876_v38 }
 0xbf9   :  { %2001 = vpow2.f32 %v1877_v48 }
 0xbfe   :  { %v1996_v28 = vpop.eup %1995 }
 0xbff   :  { %1068 = vrot.lane.b32.xlu1 %v1996_v28, %s2122_s0 }
 0xc04   :  { %v1998_v36 = vpop.eup %1997 }
 0xc05   :  { %1070 = vrot.lane.b32.xlu0 %v1998_v36, %s2122_s0  ;;  %v2000_v21 = vpop.eup %1999 }
 0xc06   :  { %v1056_v34 = vadd.f32 1.0, %v2000_v21  ;;  %v2002_v45 = vpop.eup %2001 }
 0xc07   :  { %v1057_v44 = vadd.f32 1.0, %v2002_v45 }
 0xc08   :  { %2003 = vrcp.f32 %v1056_v34 }
 0xc09   :  { %2005 = vrcp.f32 %v1057_v44 }
 0xc15   :  { %v2004_v25 = vpop.eup %2003 }
 0xc16   :  { %v2006_v55 = vpop.eup %2005  ;;  %v1064_v46 = vmul.f32 %v2004_v25, %v2510_v49 }
 0xc17   :  { %v1065_v62 = vmul.f32 %v2006_v55, %v2516_v13 }
 0xc71   :  { %v1069_v51 = vpop.permute.xlu1 %1068 }
 0xc72   :  { %v1074_v43 = vmul.f32 %v2004_v25, %v1069_v51 }
 0xc74   :  { %1078 = vrot.lane.b32.xlu1 %v1074_v43, %s2123_s29 }
 0xc77   :  { %v1071_v29 = vpop.permute.xlu0 %1070 }
 0xc78   :  { %v1075_v26 = vmul.f32 %v2006_v55, %v1071_v29  ;;  %1103 = vperm.xlu1 %1906, %v1878_v53   ;;  %v1884_v29 = vld [vmem:[%s2780_s6 + $0x50] sm:$0xff] }
 0xc7a   :  { %1080 = vrot.lane.b32.xlu0 %v1075_v26, %s2123_s29 }
 0xc7e   :  { %1108 = vperm.xlu0 %1905, %v1879_v40  }
 0xce6   :  { %v1079_v3 = vpop.permute.xlu1 %1078 }
 0xce7   :  { %v2513_v9 = vadd.f32 %v1079_v3, %v1064_v46 }
 0xce9   :  { %2007 = vtanh.f32 %v2513_v9  ;;  %v1117_v32 = vsub.f32 %v2513_v9, %v2510_v49 }
 0xcec   :  { %v1081_v31 = vpop.permute.xlu0 %1080 }
 0xced   :  { %v2520_v16 = vadd.f32 %v1081_v31, %v1065_v62 }
 0xcef   :  { %2009 = vtanh.f32 %v2520_v16  ;;  %v1118_v46 = vsub.f32 %v2520_v16, %v2516_v13 }
 0xcf3   :  { %v1104_v59 = vpop.permute.xlu1 %1103 }
 0xcf4   :  { %v1119_v60 = vmul.f32 %v1117_v32, %v1104_v59 }
 0xcf6   :  { %v2008_v42 = vpop.eup %2007  ;;  %v2565_v3 = vadd.f32 %v1119_v60, %v2510_v49  ;;  %v1890_v60 = vld [vmem:[%s2780_s6 + $0x60] sm:$0xff] }
 0xcf7   :  { %1090 = vrot.lane.b32.xlu1 %v2008_v42, %s2122_s0 }
 0xcf9   :  { %v1109_v1 = vpop.permute.xlu0 %1108 }
 0xcfa   :  { %v1120_v62 = vmul.f32 %v1118_v46, %v1109_v1 }
 0xcfc   :  { %v2010_v2 = vpop.eup %2009 }
 0xcfd   :  { %1092 = vrot.lane.b32.xlu0 %v2010_v2, %s2122_s0 }
 0xd69   :  { %v1091_v17 = vpop.permute.xlu1 %1090 }
 0xd6a   :  { %v1096_v0 = vmul.f32 %v2004_v25, %v1091_v17  ;;  %v2571_v17 = vadd.f32 %v1120_v62, %v2516_v13 }
 0xd6c   :  { %v1111_v56 = vsub.f32 %v1096_v0, %v2479_v20  ;;  %v2526_v33 = vmul.f32 %v1104_v59, %v1096_v0 }
 0xd6e   :  { %v1113_v15 = vmul.f32 %v1111_v56, %v1104_v59 }
 0xd6f   :  { %v1093_v22 = vpop.permute.xlu0 %1092 }
 0xd70   :  { %v1097_v23 = vmul.f32 %v2006_v55, %v1093_v22  ;;  %v2534_v28 = vadd.f32 %v1113_v15, %v2479_v20 }
 0xd72   :  { %v1112_v24 = vsub.f32 %v1097_v23, %v2482_v37  ;;  %v2529_v52 = vmul.f32 %v1109_v1, %v1097_v23 }
 0xd74   :  { %v1114_v27 = vmul.f32 %v1112_v24, %v1109_v1  ;;  %v1125_v41 = vpack.c.bf16 %v2529_v52, %v2526_v33  ;;  %v2094_v33 = vld [vmem:[%s2778_s4 + $0x10] ss:$8 sps:$4 sm:$0xff]  }
 0xd76   :  { %v2537_v36 = vadd.f32 %v1114_v27, %v2482_v37 }
 0xd78   :  { %v1179_v38 = vpack.c.bf16 %v2537_v36, %v2534_v28 }
 0xd7a   :  { %1181 = vrot.lane.b32.xlu1 %v1179_v38, %s2123_s29 }
 0xdec   :  { %v1182_v48 = vpop.permute.xlu1 %1181 }
 0xded   :  { %1881 = vmatmul.mubr.msk.bf16.vlgmr.msra.gmra.mxu1 %vm250_vm2, %v1182_v48 }
 0xdee   :  { %1380 = vmatpush1.bf16.msra.mxu1 %v2183_v6  ;;  %1399 = vmatprep.mubr.bf16.mxu1 %v2121_v4 }
 0xdef   :  { %1381 = vmatprep.subr.bf16.mxu1 %v2198_v10 }
 0xdf2   :  { %1382 = vmatpush1.bf16.msra.mxu1 %v2203_v11 }
 0xdf3   :  { %1560 = vmatprep.subr.bf16.mxu1 %v2178_v5 }
 0xead   :  { %v1220_v20 = vpop.f32.mrf.mxu1 }
 0xeae   :  { %v1229_v37 = vadd.f32 %v1220_v20, %v2250_v50 }
 0xeaf   :  { %v1222_v21 = vpop.f32.mrf.mxu1 }
 0xeb0   :  { %2011 = vtanh.f32 %v1229_v37  ;;  %v1882_v10 = vmul.f32 -1.442695, %v1229_v37 }
 0xeb1   :  { %v1223_v34 = vpop.f32.mrf.mxu1 }
 0xeb3   :  { %v1224_v45 = vpop.f32.mrf.mxu1 }
 0xeb4   :  { %v1230_v44 = vadd.f32 %v1224_v45, %v2239_v39 }
 0xeb6   :  { %2013 = vtanh.f32 %v1230_v44  ;;  %v1883_v11 = vmul.f32 -1.442695, %v1230_v44 }
 0xeb7   :  { %2015 = vpow2.f32 %v1882_v10 }
 0xeb8   :  { %2017 = vpow2.f32 %v1883_v11 }
 0xebd   :  { %v2012_v25 = vpop.eup %2011 }
 0xebe   :  { %1249 = vrot.lane.b32.xlu0 %v2012_v25, %s2122_s0 }
 0xec3   :  { %v2014_v6 = vpop.eup %2013 }
 0xec4   :  { %1251 = vrot.lane.b32.xlu1 %v2014_v6, %s2122_s0  ;;  %v2016_v5 = vpop.eup %2015  ;;  %v2091_v6 = vld [vmem:[%s2777_s3 + $0x10] ss:$8 sps:$4 sm:$0xff]  }
 0xec5   :  { %v1237_v51 = vadd.f32 1.0, %v2016_v5  ;;  %v2018_v50 = vpop.eup %2017 }
 0xec6   :  { %v1238_v43 = vadd.f32 1.0, %v2018_v50 }
 0xec7   :  { %2019 = vrcp.f32 %v1237_v51 }
 0xec8   :  { %2021 = vrcp.f32 %v1238_v43 }
 0xed4   :  { %v2020_v53 = vpop.eup %2019 }
 0xed5   :  { %v2022_v26 = vpop.eup %2021  ;;  %v1245_v31 = vmul.f32 %v2020_v53, %v2565_v3 }
 0xed6   :  { %v1246_v9 = vmul.f32 %v2022_v26, %v2571_v17 }
 0xf30   :  { %v1250_v55 = vpop.permute.xlu0 %1249 }
 0xf31   :  { %v1255_v39 = vmul.f32 %v2020_v53, %v1250_v55 }
 0xf33   :  { %1259 = vrot.lane.b32.xlu0 %v1255_v39, %s2123_s29 }
 0xf36   :  { %v1252_v40 = vpop.permute.xlu1 %1251 }
 0xf37   :  { %v1256_v61 = vmul.f32 %v2022_v26, %v1252_v40  ;;  %1284 = vperm.xlu0 %1905, %v1884_v29  }
 0xf39   :  { %1261 = vrot.lane.b32.xlu1 %v1256_v61, %s2123_s29 }
 0xf3d   :  { %1289 = vperm.xlu1 %1906, %v1885_v57  }
 0xfa5   :  { %v1260_v42 = vpop.permute.xlu0 %1259 }
 0xfa6   :  { %v2568_v2 = vadd.f32 %v1260_v42, %v1245_v31  ;;  %v1891_v42 = vld [vmem:[%s2780_s6 + $0x68] sm:$0xff] }
 0xfa8   :  { %2023 = vtanh.f32 %v2568_v2 }
 0xfab   :  { %v1262_v59 = vpop.permute.xlu1 %1261 }
 0xfac   :  { %v2575_v0 = vadd.f32 %v1262_v59, %v1246_v9  ;;  %v1298_v9 = vsub.f32 %v2568_v2, %v2565_v3 }
 0xfae   :  { %2025 = vtanh.f32 %v2575_v0 }
 0xfb2   :  { %v1285_v1 = vpop.permute.xlu0 %1284 }
 0xfb3   :  { %v1300_v59 = vmul.f32 %v1298_v9, %v1285_v1 }
 0xfb5   :  { %v2024_v49 = vpop.eup %2023 }
 0xfb6   :  { %1271 = vrot.lane.b32.xlu0 %v2024_v49, %s2122_s0  ;;  %v1299_v49 = vsub.f32 %v2575_v0, %v2571_v17 }
 0xfb8   :  { %v1290_v13 = vpop.permute.xlu1 %1289 }
 0xfbb   :  { %v2026_v16 = vpop.eup %2025 }
 0xfbc   :  { %1273 = vrot.lane.b32.xlu1 %v2026_v16, %s2122_s0  ;;  %v2625_v16 = vadd.f32 %v1300_v59, %v2565_v3 }
0x1028   :  { %v1272_v56 = vpop.permute.xlu0 %1271 }
0x1029   :  { %v1277_v22 = vmul.f32 %v2020_v53, %v1272_v56  ;;  %v1301_v56 = vmul.f32 %v1299_v49, %v1290_v13 }
0x102b   :  { %v1292_v23 = vsub.f32 %v1277_v22, %v2534_v28  ;;  %v2581_v38 = vmul.f32 %v1285_v1, %v1277_v22 }
0x102d   :  { %v1294_v27 = vmul.f32 %v1292_v23, %v1285_v1 }
0x102e   :  { %v1274_v15 = vpop.permute.xlu1 %1273 }
0x102f   :  { %v1278_v24 = vmul.f32 %v2022_v26, %v1274_v15  ;;  %v2589_v34 = vadd.f32 %v1294_v27, %v2534_v28  ;;  %v2092_v28 = vld [vmem:[%s2777_s3 + $0x4] ss:$8 sps:$4 sm:$0xff]  }
0x1031   :  { %v1293_v48 = vsub.f32 %v1278_v24, %v2537_v36  ;;  %v2584_v20 = vmul.f32 %v1290_v13, %v1278_v24  ;;  %v2631_v24 = vadd.f32 %v1301_v56, %v2571_v17  ;;  %v1897_v56 = vld [vmem:[%s2780_s6 + $0x78] sm:$0xff] }
0x1033   :  { %v1295_v37 = vmul.f32 %v1293_v48, %v1290_v13  ;;  %v1306_v21 = vpack.c.bf16 %v2584_v20, %v2581_v38  ;;  %v2096_v38 = vld [vmem:[%s2778_s4] ss:$8 sps:$4 sm:$0xff]   ;;  %v2097_v20 = vld [vmem:[%s2778_s4 + $0x14] ss:$8 sps:$4 sm:$0xff]  }
0x1035   :  { %v2592_v45 = vadd.f32 %v1295_v37, %v2537_v36  ;;  %v2093_v36 = vld [vmem:[%s2777_s3] ss:$8 sps:$4 sm:$0xff]  }
0x1037   :  { %v1360_v44 = vpack.c.bf16 %v2592_v45, %v2589_v34 }
0x1039   :  { %1362 = vrot.lane.b32.xlu0 %v1360_v44, %s2123_s29 }
0x10ab   :  { %v1363_v25 = vpop.permute.xlu0 %1362 }
0x10ac   :  { %1887 = vmatmul.mubr.msk.bf16.vlgmr.msra.gmra.mxu1 %vm250_vm2, %v1363_v25 }
0x10ad   :  { %1561 = vmatpush1.bf16.msra.mxu1 %v2091_v6  ;;  %1580 = vmatprep.mubr.bf16.mxu1 %v2121_v4 }
0x10ae   :  { %1562 = vmatprep.subr.bf16.mxu1 %v2092_v28 }
0x10b1   :  { %1563 = vmatpush1.bf16.msra.mxu1 %v2093_v36 }
0x116c   :  { %v1401_v10 = vpop.f32.mrf.mxu1 }
0x116d   :  { %v1410_v11 = vadd.f32 %v1401_v10, %v2254_v54 }
0x116e   :  { %v1403_v5 = vpop.f32.mrf.mxu1 }
0x116f   :  { %2027 = vtanh.f32 %v1410_v11  ;;  %v1888_v39 = vmul.f32 -1.442695, %v1410_v11 }
0x1170   :  { %v1404_v51 = vpop.f32.mrf.mxu1 }
0x1172   :  { %v1405_v50 = vpop.f32.mrf.mxu1 }
0x1173   :  { %v1411_v43 = vadd.f32 %v1405_v50, %v2235_v35 }
0x1175   :  { %2029 = vtanh.f32 %v1411_v43  ;;  %v1889_v29 = vmul.f32 -1.442695, %v1411_v43 }
0x1176   :  { %2031 = vpow2.f32 %v1888_v39 }
0x1177   :  { %2033 = vpow2.f32 %v1889_v29 }
0x117c   :  { %v2028_v53 = vpop.eup %2027 }
0x117d   :  { %1430 = vrot.lane.b32.xlu1 %v2028_v53, %s2122_s0 }
0x1182   :  { %v2030_v55 = vpop.eup %2029 }
0x1183   :  { %1432 = vrot.lane.b32.xlu0 %v2030_v55, %s2122_s0  ;;  %v2032_v26 = vpop.eup %2031 }
0x1184   :  { %v1418_v40 = vadd.f32 1.0, %v2032_v26  ;;  %v2034_v54 = vpop.eup %2033 }
0x1185   :  { %v1419_v61 = vadd.f32 1.0, %v2034_v54 }
0x1186   :  { %2035 = vrcp.f32 %v1418_v40 }
0x1187   :  { %2037 = vrcp.f32 %v1419_v61 }
0x1193   :  { %v2036_v57 = vpop.eup %2035 }
0x1194   :  { %v2038_v46 = vpop.eup %2037  ;;  %v1426_v22 = vmul.f32 %v2036_v57, %v2625_v16 }
0x1195   :  { %v1427_v2 = vmul.f32 %v2038_v46, %v2631_v24 }
0x11ef   :  { %v1431_v32 = vpop.permute.xlu1 %1430 }
0x11f0   :  { %v1436_v35 = vmul.f32 %v2036_v57, %v1431_v32 }
0x11f2   :  { %1440 = vrot.lane.b32.xlu1 %v1436_v35, %s2123_s29 }
0x11f5   :  { %v1433_v62 = vpop.permute.xlu0 %1432 }
0x11f6   :  { %v1437_v31 = vmul.f32 %v2038_v46, %v1433_v62  ;;  %1465 = vperm.xlu1 %1906, %v1890_v60  }
0x11f8   :  { %1442 = vrot.lane.b32.xlu0 %v1437_v31, %s2123_s29 }
0x11fc   :  { %1470 = vperm.xlu0 %1905, %v1891_v42   ;;  %v1896_v42 = vld [vmem:[%s2780_s6 + $0x70] sm:$0xff] }
0x1264   :  { %v1441_v23 = vpop.permute.xlu1 %1440 }
0x1265   :  { %v2628_v15 = vadd.f32 %v1441_v23, %v1426_v22 }
0x1267   :  { %2039 = vtanh.f32 %v2628_v15  ;;  %v1479_v22 = vsub.f32 %v2628_v15, %v2625_v16 }
0x126a   :  { %v1443_v1 = vpop.permute.xlu0 %1442 }
0x126b   :  { %v2635_v27 = vadd.f32 %v1443_v1, %v1427_v2 }
0x126d   :  { %2041 = vtanh.f32 %v2635_v27  ;;  %v1480_v2 = vsub.f32 %v2635_v27, %v2631_v24 }
0x1271   :  { %v1466_v13 = vpop.permute.xlu1 %1465 }
0x1272   :  { %v1481_v23 = vmul.f32 %v1479_v22, %v1466_v13 }
0x1274   :  { %v2040_v3 = vpop.eup %2039  ;;  %v1483_v1 = vadd.f32 %v1481_v23, %v2625_v16 }
0x1275   :  { %1452 = vrot.lane.b32.xlu1 %v2040_v3, %s2122_s0 }
0x1277   :  { %v1471_v17 = vpop.permute.xlu0 %1470 }
0x1278   :  { %v1482_v3 = vmul.f32 %v1480_v2, %v1471_v17 }
0x127a   :  { %v2042_v0 = vpop.eup %2041 }
0x127b   :  { %1454 = vrot.lane.b32.xlu0 %v2042_v0, %s2122_s0 }
0x12e7   :  { %v1453_v48 = vpop.permute.xlu1 %1452 }
0x12e8   :  { %v1458_v37 = vmul.f32 %v2036_v57, %v1453_v48 }
0x12ea   :  { %v1473_v44 = vsub.f32 %v1458_v37, %v2589_v34  ;;  %v2641_v36 = vmul.f32 %v1466_v13, %v1458_v37 }
0x12ec   :  { %v1475_v28 = vmul.f32 %v1473_v44, %v1466_v13  ;;  %v1484_v44 = vadd.f32 %v1482_v3, %v2631_v24 }
0x12ed   :  { %v1455_v25 = vpop.permute.xlu0 %1454 }
0x12ee   :  { %v1459_v6 = vmul.f32 %v2038_v46, %v1455_v25  ;;  %v1477_v50 = vadd.f32 %v1475_v28, %v2589_v34 }
0x12f0   :  { %v1474_v10 = vsub.f32 %v1459_v6, %v2592_v45  ;;  %v2644_v11 = vmul.f32 %v1471_v17, %v1459_v6 }
0x12f2   :  { %v1476_v5 = vmul.f32 %v1474_v10, %v1471_v17  ;;  %v1487_v51 = vpack.c.bf16 %v2644_v11, %v2641_v36 }
0x12f4   :  { %v1478_v43 = vadd.f32 %v1476_v5, %v2592_v45 }
0x12f6   :  { %v1541_v53 = vpack.c.bf16 %v1478_v43, %v1477_v50 }
0x12f8   :  { %1543 = vrot.lane.b32.xlu1 %v1541_v53, %s2123_s29 }
0x136a   :  { %v1544_v55 = vpop.permute.xlu1 %1543 }
0x136b   :  { %1893 = vmatmul.mubr.msk.bf16.vlgmr.msra.gmra.mxu1 %vm250_vm2, %v1544_v55 }
0x142b   :  { %v1582_v39 = vpop.f32.mrf.mxu1 }
0x142c   :  { %v1591_v29 = vadd.f32 %v1582_v39, %v2258_v58 }
0x142d   :  { %v1584_v26 = vpop.f32.mrf.mxu1 }
0x142e   :  { %2043 = vtanh.f32 %v1591_v29  ;;  %v1894_v45 = vmul.f32 -1.442695, %v1591_v29 }
0x142f   :  { %v1585_v40 = vpop.f32.mrf.mxu1 }
0x1431   :  { %v1586_v54 = vpop.f32.mrf.mxu1 }
0x1432   :  { %v1592_v61 = vadd.f32 %v1586_v54, %v2231_v30 }
0x1434   :  { %2045 = vtanh.f32 %v1592_v61  ;;  %v1895_v32 = vmul.f32 -1.442695, %v1592_v61 }
0x1435   :  { %2047 = vpow2.f32 %v1894_v45 }
0x1436   :  { %2049 = vpow2.f32 %v1895_v32 }
0x143b   :  { %v2044_v57 = vpop.eup %2043 }
0x143c   :  { %1611 = vrot.lane.b32.xlu0 %v2044_v57, %s2122_s0 }
0x1441   :  { %v2046_v34 = vpop.eup %2045 }
0x1442   :  { %1613 = vrot.lane.b32.xlu1 %v2046_v34, %s2122_s0  ;;  %v2048_v35 = vpop.eup %2047  ;;  %v806_v34 = vld [vmem:[#allocation3 + $0x10] sm:$0xff] }
0x1443   :  { %v1599_v60 = vadd.f32 1.0, %v2048_v35  ;;  %v2050_v58 = vpop.eup %2049  ;;  %v991_v35 = vld [vmem:[#allocation3 + $0x18] sm:$0xff] }
0x1444   :  { %v1600_v46 = vadd.f32 1.0, %v2050_v58 }
0x1445   :  { %2051 = vrcp.f32 %v1599_v60 }
0x1446   :  { %2053 = vrcp.f32 %v1600_v46 }
0x1452   :  { %v2052_v62 = vpop.eup %2051 }
0x1453   :  { %v2054_v9 = vpop.eup %2053  ;;  %v1607_v0 = vmul.f32 %v2052_v62, %v1483_v1 }
0x1454   :  { %v1608_v25 = vmul.f32 %v2054_v9, %v1484_v44 }
0x14ae   :  { %v1612_v31 = vpop.permute.xlu0 %1611 }
0x14af   :  { %v1617_v30 = vmul.f32 %v2052_v62, %v1612_v31  ;;  %v810_v31 = vld [vmem:[#allocation3 + $0x28] sm:$0xff] }
0x14b1   :  { %1621 = vrot.lane.b32.xlu0 %v1617_v30, %s2123_s29 }
0x14b4   :  { %v1614_v59 = vpop.permute.xlu1 %1613 }
0x14b5   :  { %v1618_v49 = vmul.f32 %v2054_v9, %v1614_v59  ;;  %1646 = vperm.xlu0 %1905, %v1896_v42  }
0x14b7   :  { %1623 = vrot.lane.b32.xlu1 %v1618_v49, %s2123_s29  ;;  %v2098_v49 = vld [vmem:[#allocation3 + $0x10] sm:$0xff] }
0x14bb   :  { %1651 = vperm.xlu1 %1906, %v1897_v56   ;;  %v622_v56 = vadd.f32 %v2098_v49, %v2377_v47 }
0x1523   :  { %v1622_v48 = vpop.permute.xlu0 %1621 }
0x1524   :  { %v1627_v37 = vadd.f32 %v1622_v48, %v1607_v0  ;;  %v626_v48 = vadd.f32 %v2098_v49, %v2379_v8 }
0x1526   :  { %2055 = vtanh.f32 %v1627_v37 }
0x1529   :  { %v1624_v6 = vpop.permute.xlu1 %1623 }
0x152a   :  { %v1628_v28 = vadd.f32 %v1624_v6, %v1608_v25 }
0x152c   :  { %2057 = vtanh.f32 %v1628_v28  ;;  %v1707_v28 = vld [vmem:[#allocation3] sm:$0xff] }
0x1530   :  { %v1647_v7 = vpop.permute.xlu0 %1646 }
0x1533   :  { %v2056_v36 = vpop.eup %2055 }
0x1534   :  { %1633 = vrot.lane.b32.xlu0 %v2056_v36, %s2122_s0 }
0x1538   :  { %759 = vrot.lane.b32.xlu0 %v757_v14, %s2123_s29  ;;  %v1652_v14 = vpop.permute.xlu1 %1651 }
0x1539   :  { %v2058_v16 = vpop.eup %2057 }
0x153a   :  { %1635 = vrot.lane.b32.xlu1 %v2058_v16, %s2122_s0  ;;  %v1704_v16 = vld [vmem:[#allocation3 + $0x38] sm:$0xff] }
0x153c   :  { %1127 = vrot.lane.b32.xlu0 %v1125_v41, %s2123_s29 }
0x153e   :  { %944 = vrot.lane.b32.xlu1 %v942_v19, %s2123_s29  ;;  %v2095_v19 = vld [vmem:[%s2778_s4 + $0x4] ss:$8 sps:$4 sm:$0xff]   ;;  %s2124_s4 = smov [#allocation3]  }
0x1540   :  { %1489 = vrot.lane.b32.xlu0 %v1487_v51, %s2123_s29 }
0x1542   :  { %1308 = vrot.lane.b32.xlu1 %v1306_v21, %s2123_s29 }
0x15a6   :  { %v1634_v12 = vpop.permute.xlu0 %1633 }
0x15a7   :  { %v1639_v24 = vmul.f32 %v2052_v62, %v1634_v12 }
0x15a9   :  { %v1654_v52 = vmul.f32 %v1647_v7, %v1639_v24 }
0x15aa   :  { %v760_v15 = vpop.permute.xlu0 %759 }
0x15ab   :  { %1868 = vmatmul.mubr.msk.bf16.vlgmr.msra.gmra.mxu0 %vm250_vm2, %v760_v15 }
0x15ac   :  { %962 = vmatpush1.bf16.msra.mxu0 %v2094_v33  ;;  %v1636_v63 = vpop.permute.xlu1 %1635  ;;  %981 = vmatprep.mubr.bf16.mxu0 %v2121_v4 }
0x15ad   :  { %v1640_v18 = vmul.f32 %v2054_v9, %v1636_v63  ;;  %963 = vmatprep.subr.bf16.mxu0 %v2095_v19  ;;  %v995_v9 = vld [vmem:[#allocation3 + $0x20] sm:$0xff] }
0x15ae   :  { %v1128_v13 = vpop.permute.xlu0 %1127 }
0x15af   :  { %v1655_v41 = vmul.f32 %v1652_v14, %v1640_v18 }
0x15b0   :  { %964 = vmatpush1.bf16.msra.mxu0 %v2096_v38  ;;  %v945_v27 = vpop.permute.xlu1 %944 }
0x15b1   :  { %1144 = vmatprep.subr.bf16.mxu0 %v2097_v20  ;;  %v1656_v21 = vpack.c.bf16 %v1655_v41, %v1654_v52 }
0x15b2   :  { %v1490_v10 = vpop.permute.xlu0 %1489 }
0x15b3   :  { %1658 = vrot.lane.b32.xlu1 %v1656_v21, %s2123_s29  ;;  %1874 = vmatmul.mubr.msk.bf16.vlgmr.msra.gmra.mxu0 %vm250_vm2, %v945_v27  ;;  %s1819_s29 = sshll.u32 %s2124_s4, 4  ;;  %s1820_s29 = int_to_ptr.vmem [resolvable:$true] %s1819_s29 }
0x15b4   :  { %1145 = vmatpush1.bf16.msra.mxu0 %v2094_v33  ;;  %1164 = vmatprep.mubr.bf16.mxu0 %v2121_v4  ;;  %v1309_v17 = vpop.permute.xlu1 %1308  ;;  %s2099_s8 = scalar_lea.vmem %s1820_s29, 1024  ;;  %p2104_p1 = scmp.lt.s32.totalorder %s1820_s29, %s1820_s29 }
0x15b5   :  { %1146 = vmatprep.subr.bf16.mxu0 %v2095_v19  ;;  %p2100_p0 = scmp.ne.s32.totalorder %s1820_s29, %s2099_s8  ;;  %p2105_p2 = scmp.lt.s32.totalorder %s2099_s8, %s2099_s8 }
0x15b7   :  { %p2106_p3 = por %p2105_p2, %p2104_p1 }
0x15b8   :  { %1147 = vmatpush1.bf16.msra.mxu0 %v2096_v38 }
0x15b9   :  { %1325 = vmatprep.subr.bf16.mxu0 %v2097_v20  ;;  %p2107_p4 = pnand %p2106_p3, %p2100_p0 }
0x15bb   :  { %1880 = vmatmul.mubr.msk.bf16.vlgmr.msra.gmra.mxu0 %vm250_vm2, %v1128_v13 }
0x15bc   :  { %1326 = vmatpush1.bf16.msra.mxu0 %v2094_v33  ;;  %1345 = vmatprep.mubr.bf16.mxu0 %v2121_v4 }
0x15bd   :  { %1327 = vmatprep.subr.bf16.mxu0 %v2095_v19 }
0x15c0   :  { %1328 = vmatpush1.bf16.msra.mxu0 %v2096_v38 }
0x15c1   :  { %1506 = vmatprep.subr.bf16.mxu0 %v2097_v20 }
0x15c3   :  { %1886 = vmatmul.mubr.msk.bf16.vlgmr.msra.gmra.mxu0 %vm250_vm2, %v1309_v17 }
0x15c4   :  { %1507 = vmatpush1.bf16.msra.mxu0 %v2094_v33  ;;  %1526 = vmatprep.mubr.bf16.mxu0 %v2121_v4 }
0x15c5   :  { %1508 = vmatprep.subr.bf16.mxu0 %v2095_v19 }
0x15c8   :  { %1509 = vmatpush1.bf16.msra.mxu0 %v2096_v38 }
0x15c9   :  { %1675 = vmatprep.subr.bf16.mxu0 %v2097_v20 }
0x15cb   :  { %1892 = vmatmul.mubr.msk.bf16.vlgmr.msra.gmra.mxu0 %vm250_vm2, %v1490_v10 }
0x15cc   :  { %1676 = vmatpush1.bf16.msra.mxu0 %v2094_v33  ;;  %1695 = vmatprep.mubr.bf16.mxu0 %v2121_v4 }
0x15cd   :  { %1677 = vmatprep.subr.bf16.mxu0 %v2095_v19 }
0x15d0   :  { %1678 = vmatpush1.bf16.msra.mxu0 %v2096_v38 }
0x1625   :  { %v1659_v11 = vpop.permute.xlu1 %1658 }
0x1626   :  { %1898 = vmatmul.mubr.msk.bf16.vlgmr.msra.gmra.mxu0 %vm250_vm2, %v1659_v11 }
0x166b   :  { %v798_v5 = vpop.f32.mrf.mxu0 }
0x166c   :  { %v807_v32 = vadd.f32 %v806_v34, %v798_v5 }
0x166d   :  { %v800_v51 = vpop.f32.mrf.mxu0 }
0x166f   :  { %v801_v50 = vpop.f32.mrf.mxu0 }
0x1671   :  { %v802_v43 = vpop.f32.mrf.mxu0 }
0x1672   :  { %v811_v22 = vadd.f32 %v810_v31, %v802_v43 }
0x1673   :  { %v983_v53 = vpop.f32.mrf.mxu0 }
0x1674   :  { %v992_v62 = vadd.f32 %v991_v35, %v983_v53 }
0x1675   :  { %v985_v55 = vpop.f32.mrf.mxu0 }
0x1677   :  { %v986_v39 = vpop.f32.mrf.mxu0 }
0x1679   :  { %v987_v29 = vpop.f32.mrf.mxu0 }
0x167a   :  { %v996_v2 = vadd.f32 %v995_v9, %v987_v29 }
0x167b   :  { %v1166_v26 = vpop.f32.mrf.mxu0 }
0x167c   :  { %v2726_v0 = vadd.f32 %v1166_v26, %v996_v2 }
0x167d   :  { %v1168_v40 = vpop.f32.mrf.mxu0 }
0x167f   :  { %v1169_v54 = vpop.f32.mrf.mxu0 }
0x1681   :  { %v1170_v61 = vpop.f32.mrf.mxu0 }
0x1682   :  { %v2716_v42 = vadd.f32 %v1170_v61, %v992_v62 }
0x1683   :  { %v1347_v57 = vpop.f32.mrf.mxu0 }
0x1684   :  { %v2720_v1 = vadd.f32 %v1347_v57, %v811_v22 }
0x1685   :  { %v1349_v4 = vpop.f32.mrf.mxu0 }
0x1687   :  { %v1350_v45 = vpop.f32.mrf.mxu0 }
0x1689   :  { %v1351_v60 = vpop.f32.mrf.mxu0 }
0x168a   :  { %v2713_v58 = vadd.f32 %v1351_v60, %v807_v32 }
0x168b   :  { %v1528_v46 = vpop.f32.mrf.mxu0 }
0x168c   :  { %1722 = vmax.xlane.f32.xlu0 %v2713_v58  ;;  %v2730_v47 = vadd.f32 %v1528_v46, %v626_v48 }
0x168d   :  { %v1530_v30 = vpop.f32.mrf.mxu0 }
0x168f   :  { %v1531_v59 = vpop.f32.mrf.mxu0 }
0x1690   :  { %1724 = vmax.xlane.f32.xlu0 %v2716_v42 }
0x1691   :  { %v1532_v23 = vpop.f32.mrf.mxu0 }
0x1692   :  { %v2722_v3 = vadd.f32 %v1532_v23, %v622_v56 }
0x1694   :  { %1720 = vmax.xlane.f32.xlu1 %v2722_v3  ;;  %1728 = vmax.xlane.f32.xlu0 %v2720_v1 }
0x1698   :  { %1726 = vmax.xlane.f32.xlu1 %v2726_v0 }
0x169c   :  { %1730 = vmax.xlane.f32.xlu1 %v2730_v47 }
0x16e6   :  { %v1697_v37 = vpop.f32.mrf.mxu0 }
0x16e7   :  { %v2736_v7 = vadd.f32 %v1704_v16, %v1697_v37 }
0x16e8   :  { %v1699_v44 = vpop.f32.mrf.mxu0 }
0x16ea   :  { %v1700_v25 = vpop.f32.mrf.mxu0 }
0x16ec   :  { %v1701_v6 = vpop.f32.mrf.mxu0 }
0x16ed   :  { %v2733_v36 = vadd.f32 %v1707_v28, %v1701_v6 }
0x16ef   :  { %1718 = vmax.xlane.f32.xlu0 %v2733_v36 }
0x16f3   :  { %1732 = vmax.xlane.f32.xlu0 %v2736_v7 }
0x1715   :  { %v1723_v8 = vpop.xlane.xlu0 %1722 }
0x1716   :  { %v1736_v12 = vsub.f32 %v2713_v58, %v1723_v8 }
0x1718   :  { %v1746_v14 = vmul.f32 1.442695, %v1736_v12 }
0x1719   :  { %v2740_v15 = vpop.xlane.xlu0 %1724 }
0x171a   :  { %2059 = vpow2.f32 %v1746_v14  ;;  %v1737_v63 = vsub.f32 %v2716_v42, %v2740_v15 }
0x171c   :  { %v1748_v38 = vmul.f32 1.442695, %v1737_v63 }
0x171d   :  { %v1721_v24 = vpop.xlane.xlu1 %1720  ;;  %v2745_v18 = vpop.xlane.xlu0 %1728 }
0x171e   :  { %v1735_v33 = vsub.f32 %v2722_v3, %v1721_v24  ;;  %v1739_v20 = vsub.f32 %v2720_v1, %v2745_v18 }
0x1720   :  { %v1744_v19 = vmul.f32 1.442695, %v1735_v33  ;;  %v1752_v13 = vmul.f32 1.442695, %v1739_v20 }
0x1721   :  { %v1727_v52 = vpop.xlane.xlu1 %1726 }
0x1722   :  { %v1738_v41 = vsub.f32 %v2726_v0, %v1727_v52  ;;  %2061 = vpow2.f32 %v1744_v19 }
0x1724   :  { %v1750_v21 = vmul.f32 1.442695, %v1738_v41 }
0x1725   :  { %v2750_v51 = vpop.xlane.xlu1 %1730 }
0x1726   :  { %2063 = vpow2.f32 %v1750_v21  ;;  %v1740_v50 = vsub.f32 %v2730_v47, %v2750_v51 }
0x1727   :  { %v2060_v27 = vpop.eup %2059  ;;  %2065 = vpow2.f32 %v1748_v38 }
0x1728   :  { %1762 = vadd.xlane.f32.xlu1 %v2060_v27  ;;  %2067 = vpow2.f32 %v1752_v13  ;;  %v1754_v39 = vmul.f32 1.442695, %v1740_v50 }
0x172f   :  { %v2062_v17 = vpop.eup %2061 }
0x1730   :  { %1760 = vadd.xlane.f32.xlu0 %v2062_v17 }
0x1733   :  { %v2064_v10 = vpop.eup %2063 }
0x1734   :  { %v2066_v11 = vpop.eup %2065  ;;  %1766 = vadd.xlane.f32.xlu1 %v2064_v10 }
0x1735   :  { %1764 = vadd.xlane.f32.xlu0 %v2066_v11  ;;  %v2068_v5 = vpop.eup %2067 }
0x1739   :  { %1768 = vadd.xlane.f32.xlu0 %v2068_v5 }
0x1778   :  { %v1719_v43 = vpop.xlane.xlu0 %1718 }
0x1779   :  { %v1734_v53 = vsub.f32 %v2733_v36, %v1719_v43 }
0x177b   :  { %v1742_v55 = vmul.f32 1.442695, %v1734_v53 }
0x177c   :  { %v2755_v29 = vpop.xlane.xlu0 %1732 }
0x177d   :  { %2069 = vpow2.f32 %v1742_v55  ;;  %v1741_v26 = vsub.f32 %v2736_v7, %v2755_v29 }
0x177e   :  { %2071 = vpow2.f32 %v1754_v39 }
0x177f   :  { %v1756_v40 = vmul.f32 1.442695, %v1741_v26 }
0x1781   :  { %2073 = vpow2.f32 %v1756_v40 }
0x178a   :  { %v2070_v54 = vpop.eup %2069 }
0x178b   :  { %1758 = vadd.xlane.f32.xlu1 %v2070_v54  ;;  %v2072_v61 = vpop.eup %2071 }
0x178e   :  { %v2074_v57 = vpop.eup %2073 }
0x178f   :  { %1770 = vadd.xlane.f32.xlu1 %v2072_v61  ;;  %1772 = vadd.xlane.f32.xlu0 %v2074_v57 }
0x17b1   :  { %v1763_v34 = vpop.xlane.xlu1 %1762 }
0x17b2   :  { %2075 = vlog2.f32 %v1763_v34 }
0x17b9   :  { %v1761_v4 = vpop.xlane.xlu0 %1760 }
0x17ba   :  { %2077 = vlog2.f32 %v1761_v4 }
0x17bd   :  { %v1767_v45 = vpop.xlane.xlu1 %1766 }
0x17be   :  { %2079 = vlog2.f32 %v1767_v45  ;;  %v1765_v32 = vpop.xlane.xlu0 %1764 }
0x17bf   :  { %v2076_v35 = vpop.eup %2075  ;;  %2081 = vlog2.f32 %v1765_v32 }
0x17c0   :  { %v1779_v60 = vmul.f32 0.6931472, %v2076_v35 }
0x17c2   :  { %v1792_v46 = vadd.f32 %v1779_v60, %v1723_v8  ;;  %v1769_v62 = vpop.xlane.xlu0 %1768 }
0x17c3   :  { %2083 = vlog2.f32 %v1769_v62 }
0x17c4   :  { %v1800_v31 = vsub.f32 %v2713_v58, %v1792_v46 }
0x17c6   :  { %1808 = vst [vmem:[#allocation3 + $0x10] sm:$0xff] %v1800_v31 }
0x17c7   :  { %v2078_v30 = vpop.eup %2077 }
0x17c8   :  { %v1777_v9 = vmul.f32 0.6931472, %v2078_v30 }
0x17ca   :  { %v1791_v49 = vadd.f32 %v1777_v9, %v1721_v24 }
0x17cb   :  { %v2080_v59 = vpop.eup %2079 }
0x17cc   :  { %v2082_v56 = vpop.eup %2081  ;;  %v1783_v22 = vmul.f32 0.6931472, %v2080_v59  ;;  %v1799_v23 = vsub.f32 %v2722_v3, %v1791_v49 }
0x17cd   :  { %v1781_v2 = vmul.f32 0.6931472, %v2082_v56 }
0x17ce   :  { %v1794_v48 = vadd.f32 %v1783_v22, %v1727_v52  ;;  %1807 = vst [vmem:[#allocation3 + $0x8] sm:$0xff] %v1799_v23 }
0x17cf   :  { %v1793_v37 = vadd.f32 %v1781_v2, %v2740_v15 }
0x17d0   :  { %v2084_v44 = vpop.eup %2083  ;;  %v1802_v25 = vsub.f32 %v2726_v0, %v1794_v48 }
0x17d1   :  { %v1801_v6 = vsub.f32 %v2716_v42, %v1793_v37  ;;  %v1785_v58 = vmul.f32 0.6931472, %v2084_v44 }
0x17d2   :  { %1810 = vst [vmem:[#allocation3 + $0x20] sm:$0xff] %v1802_v25 }
0x17d3   :  { %1809 = vst [vmem:[#allocation3 + $0x18] sm:$0xff] %v1801_v6  ;;  %v1795_v28 = vadd.f32 %v1785_v58, %v2745_v18 }
0x17d5   :  { %v1803_v16 = vsub.f32 %v2720_v1, %v1795_v28 }
0x17d7   :  { %1811 = vst [vmem:[#allocation3 + $0x28] sm:$0xff] %v1803_v16 }
0x1814   :  { %v1759_v8 = vpop.xlane.xlu1 %1758 }
0x1815   :  { %2085 = vlog2.f32 %v1759_v8 }
0x1818   :  { %v1771_v3 = vpop.xlane.xlu1 %1770  ;;  %v1773_v12 = vpop.xlane.xlu0 %1772 }
0x1819   :  { %2087 = vlog2.f32 %v1771_v3 }
0x181a   :  { %2089 = vlog2.f32 %v1773_v12 }
0x1822   :  { %v2086_v14 = vpop.eup %2085 }
0x1823   :  { %v1775_v15 = vmul.f32 0.6931472, %v2086_v14 }
0x1825   :  { %v1790_v24 = vadd.f32 %v1775_v15, %v1719_v43 }
0x1826   :  { %v2088_v0 = vpop.eup %2087 }
0x1827   :  { %v2090_v33 = vpop.eup %2089  ;;  %v1798_v42 = vsub.f32 %v2733_v36, %v1790_v24  ;;  %v1787_v63 = vmul.f32 0.6931472, %v2088_v0 }
0x1828   :  { %v1789_v19 = vmul.f32 0.6931472, %v2090_v33 }
0x1829   :  { %1806 = vst [vmem:[#allocation3] sm:$0xff] %v1798_v42  ;;  %v1796_v1 = vadd.f32 %v1787_v63, %v2750_v51 }
0x182a   :  { %v1797_v18 = vadd.f32 %v1789_v19, %v2755_v29 }
0x182b   :  { %v1804_v52 = vsub.f32 %v2730_v47, %v1796_v1 }
0x182c   :  { %v1805_v41 = vsub.f32 %v2736_v7, %v1797_v18 }
0x182d   :  { %1812 = vst [vmem:[#allocation3 + $0x30] sm:$0xff] %v1804_v52 }
0x182e   :  { %1813 = vst [vmem:[#allocation3 + $0x38] sm:$0xff] %v1805_v41 }
0x182f   :  { %2110 = shalt.err (!%p2107_p4)
}
0x1830   :  { %s2125_s9 = smov 128   ;;  %s2126_s10 = smov 8  }
0x1831   :  { %1825 = dma.vmem_to_hbm [thread:$0]  %s1820_s29, 1024, %s2781_s7, [#allocation4], %s2125_s9, %s2125_s9, %s2126_s10  }
0x1832   :  { %2119 = dma.done.wait [#allocation4], 1024  }
0x1833   :  { %2120 = vsyncadd [#allocation4], 4294966272 }
0x1834   :  { %1829 = vsyncpa [#allocation4], 1 }

</bundles_post_ra>
